<compile_context>
chip_gen: v5e
topology: v5e:2x2
jax: 0.10.0
libtpu: 0.0.40
codegen_flags: <defaults>
</compile_context>

<pallas_src>
import math
import functools

import jax
import jax.numpy as jnp
import numpy as np
from jax import lax
from jax.experimental import pallas as pl
from jax.experimental.pallas import tpu as pltpu


def _decoder_block_body(x_ref, wq_ref, wk_ref, wv_ref, w0_ref, w1_ref, w2_ref,
                        vecs_ref, b1_ref, umask_ref, o_ref, attn_scr,
                        *, n_heads, d_head):
    S = x_ref.shape[1]
    H, dk = n_heads, d_head

    x = x_ref[0]                                    # (S, D) f32 residual path
    x_bf = x.astype(jnp.bfloat16)                   # MXU operand

    vecs = vecs_ref[...]                            # (9, D) packed f32 vectors
    bq, bk, bv, b0 = vecs[0:1], vecs[1:2], vecs[2:3], vecs[3:4]
    g1, be1 = vecs[4:5], vecs[5:6]
    b2, g2, be2 = vecs[6:7], vecs[7:8], vecs[8:9]
    b1 = b1_ref[...]                                # (1, D_FF) f32

    # ---- QKV projections: bf16 operands, f32 accumulation ------------------
    q = jnp.dot(x_bf, wq_ref[...], preferred_element_type=jnp.float32) + bq
    k = jnp.dot(x_bf, wk_ref[...], preferred_element_type=jnp.float32) + bk
    v = jnp.dot(x_bf, wv_ref[...], preferred_element_type=jnp.float32) + bv

    # fold 1/sqrt(dk) into q: S*D mults instead of H*S*S
    q = q * (1.0 / math.sqrt(dk))

    # ---- head split: static lane slices stacked along a leading batch dim --
    # TODO(synk): at production d_head (a multiple of 128) this becomes a free
    # lane-block split; at dk=4 the slices are sub-lane-width and padded.
    qh = jnp.stack([q[:, h * dk:(h + 1) * dk] for h in range(H)],
                   axis=0).astype(jnp.bfloat16)     # (H, S, dk)
    kh = jnp.stack([k[:, h * dk:(h + 1) * dk] for h in range(H)],
                   axis=0).astype(jnp.bfloat16)
    vh = jnp.stack([v[:, h * dk:(h + 1) * dk] for h in range(H)],
                   axis=0).astype(jnp.bfloat16)

    # ---- all heads in one batched dot: (H,S,dk) x (H,S,dk) -> (H,S,S) ------
    s = jnp.einsum('hqd,hkd->hqk', qh, kh, preferred_element_type=jnp.float32)

    # in-kernel causal mask from iota compares (no precomputed bias input)
    row = lax.broadcasted_iota(jnp.int32, (S, S), 0)
    col = lax.broadcasted_iota(jnp.int32, (S, S), 1)
    allow = col <= row
    if umask_ref is not None:
        # torch: base_mask = mask * tril; masked_fill where base_mask == 0
        # (note: a user mask that zeroes an entire row incl. the diagonal gives
        #  a uniform softmax row here, vs. NaN in the -inf f32 reference)
        allow = jnp.logical_and(allow, umask_ref[...] != 0)
    s = s + jnp.where(allow, 0.0, -1e30)            # broadcast (S,S)->(H,S,S)

    # ---- softmax with deferred normalization -------------------------------
    m = jnp.max(s, axis=-1, keepdims=True)
    e = jnp.exp(s - m)
    denom = jnp.sum(e, axis=-1, keepdims=True)      # (H, S, 1)
    ctx = jnp.einsum('hqk,hkd->hqd', e.astype(jnp.bfloat16), vh,
                     preferred_element_type=jnp.float32)       # (H, S, dk)
    # EUP reciprocal; scale the (H,S,dk) context, not the (H,S,S) probabilities
    ctx = ctx * pl.reciprocal(denom, approx=True)

    # re-assemble heads q-major via lane-offset stores into the VMEM scratch
    for h in range(H):
        attn_scr[:, h * dk:(h + 1) * dk] = ctx[h]

    mha = jnp.dot(attn_scr[...].astype(jnp.bfloat16), w0_ref[...],
                  preferred_element_type=jnp.float32) + b0

    def layer_norm(y, g, b):
        mu = jnp.mean(y, axis=-1, keepdims=True)
        var = jnp.mean((y - mu) ** 2, axis=-1, keepdims=True)
        return (y - mu) * lax.rsqrt(var + 1e-5) * g + b

    # residual + LN1 (f32)
    x1 = layer_norm(x + mha, g1, be1)

    # ---- feed-forward network (bf16 MXU operands, f32 elementwise) ---------
    hdn = jnp.dot(x1.astype(jnp.bfloat16), w1_ref[...],
                  preferred_element_type=jnp.float32) + b1
    hdn = jnp.maximum(hdn, 0.0)
    ffn = jnp.dot(hdn.astype(jnp.bfloat16), w2_ref[...],
                  preferred_element_type=jnp.float32) + b2

    # residual + LN2
    x2 = layer_norm(x1 + ffn, g2, be2)

    # TODO(synk): masked store at D=32; production D (multiple of 128) makes
    # this lane-dense with no code change.
    o_ref[0] = x2.astype(o_ref.dtype)


def _make_kernel(n_heads, d_head, with_user_mask):
    body = functools.partial(_decoder_block_body, n_heads=n_heads, d_head=d_head)
    if with_user_mask:
        def kernel(x, wq, wk, wv, w0, w1, w2, vecs, b1, umask, o, scr):
            body(x, wq, wk, wv, w0, w1, w2, vecs, b1, umask, o, scr)
    else:
        def kernel(x, wq, wk, wv, w0, w1, w2, vecs, b1, o, scr):
            body(x, wq, wk, wv, w0, w1, w2, vecs, b1, None, o, scr)
    return kernel


def prepare_decoder_params(params):
    """One-time conversion to kernel-ready form (call OUTSIDE the per-step jit):
    GEMM weights cast to bf16 once (not per call); the small (1, D) bias /
    LayerNorm vectors packed into a single (9, D) f32 slab."""
    vecs = jnp.concatenate(
        [params['bq'], params['bk'], params['bv'], params['b0'],
         params['g1'], params['be1'], params['b2'], params['g2'],
         params['be2']], axis=0).astype(jnp.float32)            # (9, D)
    return {
        'wq': params['wq'].astype(jnp.bfloat16),
        'wk': params['wk'].astype(jnp.bfloat16),
        'wv': params['wv'].astype(jnp.bfloat16),
        'w0': params['w0'].astype(jnp.bfloat16),
        'w1': params['w1'].astype(jnp.bfloat16),
        'w2': params['w2'].astype(jnp.bfloat16),
        'vecs': vecs,
        'b1': params['b1'].astype(jnp.float32),
    }


@functools.partial(jax.jit, static_argnames=("n_heads",))
def decoder_block(x, prep, *, n_heads, mask=None):
    B, S, D = x.shape
    d_head = D // n_heads
    d_ff = prep['w1'].shape[1]
    with_user_mask = mask is not None

    kernel = _make_kernel(n_heads, d_head, with_user_mask)

    def full(shape):  # whole-array block, resident across all grid steps
        return pl.BlockSpec(shape, lambda b, _n=len(shape): (0,) * _n)

    in_specs = [
        pl.BlockSpec((1, S, D), lambda b: (b, 0, 0)),   # x: one sequence/step
        full((D, D)), full((D, D)), full((D, D)), full((D, D)),
        full((D, d_ff)), full((d_ff, D)),
        full((9, D)), full((1, d_ff)),
    ]
    args = [x, prep['wq'], prep['wk'], prep['wv'], prep['w0'],
            prep['w1'], prep['w2'], prep['vecs'], prep['b1']]
    if with_user_mask:
        in_specs.append(full((S, S)))
        args.append(jnp.asarray(mask, jnp.float32))

    return pl.pallas_call(
        kernel,
        out_shape=jax.ShapeDtypeStruct((B, S, D), x.dtype),
        grid=(B,),
        in_specs=in_specs,
        out_specs=pl.BlockSpec((1, S, D), lambda b: (b, 0, 0)),
        scratch_shapes=[pltpu.VMEM((S, D), jnp.float32)],
        compiler_params=pltpu.CompilerParams(
            dimension_semantics=("parallel",),          # megacore / v7x 2-TC
            vmem_limit_bytes=32 * 1024 * 1024),
    )(*args)


def _reference(x, p, n_heads):
    """Pure-JAX f32 reference mirroring the PyTorch forward (eval mode)."""
    B, S, D = x.shape
    dk = D // n_heads
    q = x @ p['wq'] + p['bq'][0]
    k = x @ p['wk'] + p['bk'][0]
    v = x @ p['wv'] + p['bv'][0]
    qh = q.reshape(B, S, n_heads, dk).transpose(0, 2, 1, 3)
    kh = k.reshape(B, S, n_heads, dk).transpose(0, 2, 1, 3)
    vh = v.reshape(B, S, n_heads, dk).transpose(0, 2, 1, 3)
    scores = jnp.einsum('bhqd,bhkd->bhqk', qh, kh) / math.sqrt(dk)
    causal = jnp.tril(jnp.ones((S, S)))
    scores = jnp.where(causal[None, None] == 0, -jnp.inf, scores)
    pa = jax.nn.softmax(scores, axis=-1)
    o = jnp.einsum('bhqk,bhkd->bhqd', pa, vh).transpose(0, 2, 1, 3).reshape(B, S, D)
    mha = o @ p['w0'] + p['b0'][0]

    def ln(y, g, b):
        mu = jnp.mean(y, -1, keepdims=True)
        var = jnp.mean((y - mu) ** 2, -1, keepdims=True)
        return (y - mu) * lax.rsqrt(var + 1e-5) * g[0] + b[0]

    x1 = ln(x + mha, p['g1'], p['be1'])
    f = jnp.maximum(x1 @ p['w1'] + p['b1'][0], 0.0) @ p['w2'] + p['b2'][0]
    return ln(x1 + f, p['g2'], p['be2'])


if __name__ == "__main__":
    # small shapes consistent with the module: d_model divisible by h=8
    B, S, D, H, D_FF = 2, 8, 32, 8, 64

    key = jax.random.PRNGKey(0)
    keys = jax.random.split(key, 16)
    sc = 0.1
    params = {
        'wq': jax.random.normal(keys[0], (D, D), jnp.float32) * sc,
        'bq': jax.random.normal(keys[1], (1, D), jnp.float32) * sc,
        'wk': jax.random.normal(keys[2], (D, D), jnp.float32) * sc,
        'bk': jax.random.normal(keys[3], (1, D), jnp.float32) * sc,
        'wv': jax.random.normal(keys[4], (D, D), jnp.float32) * sc,
        'bv': jax.random.normal(keys[5], (1, D), jnp.float32) * sc,
        'w0': jax.random.normal(keys[6], (D, D), jnp.float32) * sc,
        'b0': jax.random.normal(keys[7], (1, D), jnp.float32) * sc,
        'g1': jnp.ones((1, D), jnp.float32),
        'be1': jnp.zeros((1, D), jnp.float32),
        'w1': jax.random.normal(keys[8], (D, D_FF), jnp.float32) * sc,
        'b1': jax.random.normal(keys[9], (1, D_FF), jnp.float32) * sc,
        'w2': jax.random.normal(keys[10], (D_FF, D), jnp.float32) * sc,
        'b2': jax.random.normal(keys[11], (1, D), jnp.float32) * sc,
        'g2': jnp.ones((1, D), jnp.float32),
        'be2': jnp.zeros((1, D), jnp.float32),
    }

    x = jax.random.normal(keys[12], (B, S, D), jnp.float32)

    prep = prepare_decoder_params(params)       # one-time bf16 cast + packing
    out = decoder_block(x, prep, n_heads=H)
    out = jax.block_until_ready(out)

    ref = _reference(x, params, H)
    # bf16 MXU operands + approx reciprocal => widened tolerance (quantization,
    # not a kernel bug).
    np.testing.assert_allclose(np.asarray(out), np.asarray(ref),
                               rtol=5e-2, atol=5e-2)
    print("KERNEL_OK")
</pallas_src>

<mosaic_0001>
module attributes {stable_mosaic.version = 11 : i64} {
  func.func @kernel(%arg0: i32, %arg1: memref<1x8x32xf32, #tpu.memory_space<vmem>>, %arg2: memref<32x32xbf16, #tpu.memory_space<vmem>>, %arg3: memref<32x32xbf16, #tpu.memory_space<vmem>>, %arg4: memref<32x32xbf16, #tpu.memory_space<vmem>>, %arg5: memref<32x32xbf16, #tpu.memory_space<vmem>>, %arg6: memref<32x64xbf16, #tpu.memory_space<vmem>>, %arg7: memref<64x32xbf16, #tpu.memory_space<vmem>>, %arg8: memref<9x32xf32, #tpu.memory_space<vmem>>, %arg9: memref<1x64xf32, #tpu.memory_space<vmem>>, %arg10: memref<1x8x32xf32, #tpu.memory_space<vmem>>, %arg11: memref<8x32xf32, #tpu.memory_space<vmem>>) attributes {dimension_semantics = [#tpu.dimension_semantics<parallel>], iteration_bounds = array<i64: 2>, scalar_prefetch = 0 : i64, scratch_operands = 1 : i64, tpu.core_type = #tpu.core_type<tc>, window_params = [{transform_indices = @transform_0, window_bounds = array<i64: 1, 8, 32>}, {pipeline_mode = #tpu.pipeline_mode<synchronous>, transform_indices = @transform_1, window_bounds = array<i64: 32, 32>}, {pipeline_mode = #tpu.pipeline_mode<synchronous>, transform_indices = @transform_2, window_bounds = array<i64: 32, 32>}, {pipeline_mode = #tpu.pipeline_mode<synchronous>, transform_indices = @transform_3, window_bounds = array<i64: 32, 32>}, {pipeline_mode = #tpu.pipeline_mode<synchronous>, transform_indices = @transform_4, window_bounds = array<i64: 32, 32>}, {pipeline_mode = #tpu.pipeline_mode<synchronous>, transform_indices = @transform_5, window_bounds = array<i64: 32, 64>}, {pipeline_mode = #tpu.pipeline_mode<synchronous>, transform_indices = @transform_6, window_bounds = array<i64: 64, 32>}, {pipeline_mode = #tpu.pipeline_mode<synchronous>, transform_indices = @transform_7, window_bounds = array<i64: 9, 32>}, {pipeline_mode = #tpu.pipeline_mode<synchronous>, transform_indices = @transform_8, window_bounds = array<i64: 1, 64>}, {transform_indices = @transform_9, window_bounds = array<i64: 1, 8, 32>}]} {
    %c0 = arith.constant 0 : index
    %c0_0 = arith.constant 0 : index
    %c0_1 = arith.constant 0 : index
    %0 = vector.load %arg1[%c0, %c0_0, %c0_1] : memref<1x8x32xf32, #tpu.memory_space<vmem>>, vector<1x8x32xf32>
    %1 = vector.shape_cast %0 : vector<1x8x32xf32> to vector<8x32xf32>
    %2 = arith.truncf %1 : vector<8x32xf32> to vector<8x32xbf16>
    %c0_2 = arith.constant 0 : index
    %c0_3 = arith.constant 0 : index
    %3 = vector.load %arg8[%c0_2, %c0_3] : memref<9x32xf32, #tpu.memory_space<vmem>>, vector<9x32xf32>
    %4 = vector.extract_strided_slice %3 {offsets = [0, 0], sizes = [1, 32], strides = [1, 1]} : vector<9x32xf32> to vector<1x32xf32>
    %5 = vector.extract_strided_slice %3 {offsets = [1, 0], sizes = [1, 32], strides = [1, 1]} : vector<9x32xf32> to vector<1x32xf32>
    %6 = vector.extract_strided_slice %3 {offsets = [2, 0], sizes = [1, 32], strides = [1, 1]} : vector<9x32xf32> to vector<1x32xf32>
    %7 = vector.extract_strided_slice %3 {offsets = [3, 0], sizes = [1, 32], strides = [1, 1]} : vector<9x32xf32> to vector<1x32xf32>
    %8 = vector.extract_strided_slice %3 {offsets = [4, 0], sizes = [1, 32], strides = [1, 1]} : vector<9x32xf32> to vector<1x32xf32>
    %9 = vector.extract_strided_slice %3 {offsets = [5, 0], sizes = [1, 32], strides = [1, 1]} : vector<9x32xf32> to vector<1x32xf32>
    %10 = vector.extract_strided_slice %3 {offsets = [6, 0], sizes = [1, 32], strides = [1, 1]} : vector<9x32xf32> to vector<1x32xf32>
    %11 = vector.extract_strided_slice %3 {offsets = [7, 0], sizes = [1, 32], strides = [1, 1]} : vector<9x32xf32> to vector<1x32xf32>
    %12 = vector.extract_strided_slice %3 {offsets = [8, 0], sizes = [1, 32], strides = [1, 1]} : vector<9x32xf32> to vector<1x32xf32>
    %c0_4 = arith.constant 0 : index
    %c0_5 = arith.constant 0 : index
    %13 = vector.load %arg9[%c0_4, %c0_5] : memref<1x64xf32, #tpu.memory_space<vmem>>, vector<1x64xf32>
    %c0_6 = arith.constant 0 : index
    %c0_7 = arith.constant 0 : index
    %14 = vector.load %arg2[%c0_6, %c0_7] : memref<32x32xbf16, #tpu.memory_space<vmem>>, vector<32x32xbf16>
    %cst = arith.constant dense<0.000000e+00> : vector<8x32xf32>
    %15 = tpu.matmul %2, %14, %cst {dimension_numbers = #tpu.dot_dimension_numbers<[1], [0], [0], [1], [0, 0, 1, 1], [], []>} : vector<8x32xbf16>, vector<32x32xbf16>, vector<8x32xf32> -> vector<8x32xf32>
    %16 = vector.broadcast %4 : vector<1x32xf32> to vector<8x32xf32>
    %17 = arith.addf %15, %16 : vector<8x32xf32>
    %c0_8 = arith.constant 0 : index
    %c0_9 = arith.constant 0 : index
    %18 = vector.load %arg3[%c0_8, %c0_9] : memref<32x32xbf16, #tpu.memory_space<vmem>>, vector<32x32xbf16>
    %cst_10 = arith.constant dense<0.000000e+00> : vector<8x32xf32>
    %19 = tpu.matmul %2, %18, %cst_10 {dimension_numbers = #tpu.dot_dimension_numbers<[1], [0], [0], [1], [0, 0, 1, 1], [], []>} : vector<8x32xbf16>, vector<32x32xbf16>, vector<8x32xf32> -> vector<8x32xf32>
    %20 = vector.broadcast %5 : vector<1x32xf32> to vector<8x32xf32>
    %21 = arith.addf %19, %20 : vector<8x32xf32>
    %c0_11 = arith.constant 0 : index
    %c0_12 = arith.constant 0 : index
    %22 = vector.load %arg4[%c0_11, %c0_12] : memref<32x32xbf16, #tpu.memory_space<vmem>>, vector<32x32xbf16>
    %cst_13 = arith.constant dense<0.000000e+00> : vector<8x32xf32>
    %23 = tpu.matmul %2, %22, %cst_13 {dimension_numbers = #tpu.dot_dimension_numbers<[1], [0], [0], [1], [0, 0, 1, 1], [], []>} : vector<8x32xbf16>, vector<32x32xbf16>, vector<8x32xf32> -> vector<8x32xf32>
    %24 = vector.broadcast %6 : vector<1x32xf32> to vector<8x32xf32>
    %25 = arith.addf %23, %24 : vector<8x32xf32>
    %cst_14 = arith.constant 5.000000e-01 : f32
    %26 = vector.broadcast %cst_14 : f32 to vector<8x32xf32>
    %27 = arith.mulf %17, %26 : vector<8x32xf32>
    %28 = vector.extract_strided_slice %27 {offsets = [0, 0], sizes = [8, 4], strides = [1, 1]} : vector<8x32xf32> to vector<8x4xf32>
    %29 = vector.extract_strided_slice %27 {offsets = [0, 4], sizes = [8, 4], strides = [1, 1]} : vector<8x32xf32> to vector<8x4xf32>
    %30 = vector.extract_strided_slice %27 {offsets = [0, 8], sizes = [8, 4], strides = [1, 1]} : vector<8x32xf32> to vector<8x4xf32>
    %31 = vector.extract_strided_slice %27 {offsets = [0, 12], sizes = [8, 4], strides = [1, 1]} : vector<8x32xf32> to vector<8x4xf32>
    %32 = vector.extract_strided_slice %27 {offsets = [0, 16], sizes = [8, 4], strides = [1, 1]} : vector<8x32xf32> to vector<8x4xf32>
    %33 = vector.extract_strided_slice %27 {offsets = [0, 20], sizes = [8, 4], strides = [1, 1]} : vector<8x32xf32> to vector<8x4xf32>
    %34 = vector.extract_strided_slice %27 {offsets = [0, 24], sizes = [8, 4], strides = [1, 1]} : vector<8x32xf32> to vector<8x4xf32>
    %35 = vector.extract_strided_slice %27 {offsets = [0, 28], sizes = [8, 4], strides = [1, 1]} : vector<8x32xf32> to vector<8x4xf32>
    %36 = vector.shape_cast %28 : vector<8x4xf32> to vector<1x8x4xf32>
    %37 = vector.shape_cast %29 : vector<8x4xf32> to vector<1x8x4xf32>
    %38 = vector.shape_cast %30 : vector<8x4xf32> to vector<1x8x4xf32>
    %39 = vector.shape_cast %31 : vector<8x4xf32> to vector<1x8x4xf32>
    %40 = vector.shape_cast %32 : vector<8x4xf32> to vector<1x8x4xf32>
    %41 = vector.shape_cast %33 : vector<8x4xf32> to vector<1x8x4xf32>
    %42 = vector.shape_cast %34 : vector<8x4xf32> to vector<1x8x4xf32>
    %43 = vector.shape_cast %35 : vector<8x4xf32> to vector<1x8x4xf32>
    %44 = tpu.concatenate %36, %37, %38, %39, %40, %41, %42, %43 in 0 : vector<1x8x4xf32>, vector<1x8x4xf32>, vector<1x8x4xf32>, vector<1x8x4xf32>, vector<1x8x4xf32>, vector<1x8x4xf32>, vector<1x8x4xf32>, vector<1x8x4xf32> -> vector<8x8x4xf32>
    %45 = arith.truncf %44 : vector<8x8x4xf32> to vector<8x8x4xbf16>
    %46 = vector.extract_strided_slice %21 {offsets = [0, 0], sizes = [8, 4], strides = [1, 1]} : vector<8x32xf32> to vector<8x4xf32>
    %47 = vector.extract_strided_slice %21 {offsets = [0, 4], sizes = [8, 4], strides = [1, 1]} : vector<8x32xf32> to vector<8x4xf32>
    %48 = vector.extract_strided_slice %21 {offsets = [0, 8], sizes = [8, 4], strides = [1, 1]} : vector<8x32xf32> to vector<8x4xf32>
    %49 = vector.extract_strided_slice %21 {offsets = [0, 12], sizes = [8, 4], strides = [1, 1]} : vector<8x32xf32> to vector<8x4xf32>
    %50 = vector.extract_strided_slice %21 {offsets = [0, 16], sizes = [8, 4], strides = [1, 1]} : vector<8x32xf32> to vector<8x4xf32>
    %51 = vector.extract_strided_slice %21 {offsets = [0, 20], sizes = [8, 4], strides = [1, 1]} : vector<8x32xf32> to vector<8x4xf32>
    %52 = vector.extract_strided_slice %21 {offsets = [0, 24], sizes = [8, 4], strides = [1, 1]} : vector<8x32xf32> to vector<8x4xf32>
    %53 = vector.extract_strided_slice %21 {offsets = [0, 28], sizes = [8, 4], strides = [1, 1]} : vector<8x32xf32> to vector<8x4xf32>
    %54 = vector.shape_cast %46 : vector<8x4xf32> to vector<1x8x4xf32>
    %55 = vector.shape_cast %47 : vector<8x4xf32> to vector<1x8x4xf32>
    %56 = vector.shape_cast %48 : vector<8x4xf32> to vector<1x8x4xf32>
    %57 = vector.shape_cast %49 : vector<8x4xf32> to vector<1x8x4xf32>
    %58 = vector.shape_cast %50 : vector<8x4xf32> to vector<1x8x4xf32>
    %59 = vector.shape_cast %51 : vector<8x4xf32> to vector<1x8x4xf32>
    %60 = vector.shape_cast %52 : vector<8x4xf32> to vector<1x8x4xf32>
    %61 = vector.shape_cast %53 : vector<8x4xf32> to vector<1x8x4xf32>
    %62 = tpu.concatenate %54, %55, %56, %57, %58, %59, %60, %61 in 0 : vector<1x8x4xf32>, vector<1x8x4xf32>, vector<1x8x4xf32>, vector<1x8x4xf32>, vector<1x8x4xf32>, vector<1x8x4xf32>, vector<1x8x4xf32>, vector<1x8x4xf32> -> vector<8x8x4xf32>
    %63 = arith.truncf %62 : vector<8x8x4xf32> to vector<8x8x4xbf16>
    %64 = vector.extract_strided_slice %25 {offsets = [0, 0], sizes = [8, 4], strides = [1, 1]} : vector<8x32xf32> to vector<8x4xf32>
    %65 = vector.extract_strided_slice %25 {offsets = [0, 4], sizes = [8, 4], strides = [1, 1]} : vector<8x32xf32> to vector<8x4xf32>
    %66 = vector.extract_strided_slice %25 {offsets = [0, 8], sizes = [8, 4], strides = [1, 1]} : vector<8x32xf32> to vector<8x4xf32>
    %67 = vector.extract_strided_slice %25 {offsets = [0, 12], sizes = [8, 4], strides = [1, 1]} : vector<8x32xf32> to vector<8x4xf32>
    %68 = vector.extract_strided_slice %25 {offsets = [0, 16], sizes = [8, 4], strides = [1, 1]} : vector<8x32xf32> to vector<8x4xf32>
    %69 = vector.extract_strided_slice %25 {offsets = [0, 20], sizes = [8, 4], strides = [1, 1]} : vector<8x32xf32> to vector<8x4xf32>
    %70 = vector.extract_strided_slice %25 {offsets = [0, 24], sizes = [8, 4], strides = [1, 1]} : vector<8x32xf32> to vector<8x4xf32>
    %71 = vector.extract_strided_slice %25 {offsets = [0, 28], sizes = [8, 4], strides = [1, 1]} : vector<8x32xf32> to vector<8x4xf32>
    %72 = vector.shape_cast %64 : vector<8x4xf32> to vector<1x8x4xf32>
    %73 = vector.shape_cast %65 : vector<8x4xf32> to vector<1x8x4xf32>
    %74 = vector.shape_cast %66 : vector<8x4xf32> to vector<1x8x4xf32>
    %75 = vector.shape_cast %67 : vector<8x4xf32> to vector<1x8x4xf32>
    %76 = vector.shape_cast %68 : vector<8x4xf32> to vector<1x8x4xf32>
    %77 = vector.shape_cast %69 : vector<8x4xf32> to vector<1x8x4xf32>
    %78 = vector.shape_cast %70 : vector<8x4xf32> to vector<1x8x4xf32>
    %79 = vector.shape_cast %71 : vector<8x4xf32> to vector<1x8x4xf32>
    %80 = tpu.concatenate %72, %73, %74, %75, %76, %77, %78, %79 in 0 : vector<1x8x4xf32>, vector<1x8x4xf32>, vector<1x8x4xf32>, vector<1x8x4xf32>, vector<1x8x4xf32>, vector<1x8x4xf32>, vector<1x8x4xf32>, vector<1x8x4xf32> -> vector<8x8x4xf32>
    %81 = arith.truncf %80 : vector<8x8x4xf32> to vector<8x8x4xbf16>
    "tpu.trace_start"() <{level = 10 : i32, message = "hqd,hkd->hqk"}> : () -> ()
    %cst_15 = arith.constant dense<0.000000e+00> : vector<8x8x8xf32>
    %82 = tpu.matmul %45, %63, %cst_15 {dimension_numbers = #tpu.dot_dimension_numbers<[2], [2], [1], [1], [0, 0, 0, 1, 1, 1], [0], [0]>} : vector<8x8x4xbf16>, vector<8x8x4xbf16>, vector<8x8x8xf32> -> vector<8x8x8xf32>
    "tpu.trace_stop"() : () -> ()
    %83 = tpu.iota {dimensions = array<i32: 0>} : vector<8x8xi32>
    %84 = tpu.iota {dimensions = array<i32: 1>} : vector<8x8xi32>
    %85 = arith.cmpi sle, %84, %83 : vector<8x8xi32>
    %cst_16 = arith.constant 0.000000e+00 : f32
    %cst_17 = arith.constant -1.000000e+30 : f32
    %86 = vector.broadcast %cst_16 : f32 to vector<8x8xf32>
    %87 = vector.broadcast %cst_17 : f32 to vector<8x8xf32>
    %88 = arith.select %85, %86, %87 : vector<8x8xi1>, vector<8x8xf32>
    %89 = vector.shape_cast %88 : vector<8x8xf32> to vector<1x8x8xf32>
    %90 = vector.broadcast %89 : vector<1x8x8xf32> to vector<8x8x8xf32>
    %91 = arith.addf %82, %90 : vector<8x8x8xf32>
    %cst_18 = arith.constant dense<0xFF800000> : vector<8x8xf32>
    %92 = vector.multi_reduction <maximumf>, %91, %cst_18 [2] : vector<8x8x8xf32> to vector<8x8xf32>
    %93 = vector.shape_cast %92 : vector<8x8xf32> to vector<8x8x1xf32>
    %94 = vector.broadcast %93 : vector<8x8x1xf32> to vector<8x8x8xf32>
    %95 = arith.subf %91, %94 : vector<8x8x8xf32>
    %96 = math.exp %95 : vector<8x8x8xf32>
    %cst_19 = arith.constant dense<0.000000e+00> : vector<8x8xf32>
    %97 = vector.multi_reduction <add>, %96, %cst_19 [2] : vector<8x8x8xf32> to vector<8x8xf32>
    %98 = vector.shape_cast %97 : vector<8x8xf32> to vector<8x8x1xf32>
    %99 = arith.truncf %96 : vector<8x8x8xf32> to vector<8x8x8xbf16>
    "tpu.trace_start"() <{level = 10 : i32, message = "hqk,hkd->hqd"}> : () -> ()
    %cst_20 = arith.constant dense<0.000000e+00> : vector<8x8x4xf32>
    %100 = tpu.matmul %99, %81, %cst_20 {dimension_numbers = #tpu.dot_dimension_numbers<[2], [1], [1], [2], [0, 0, 0, 1, 1, 2], [0], [0]>} : vector<8x8x8xbf16>, vector<8x8x4xbf16>, vector<8x8x4xf32> -> vector<8x8x4xf32>
    "tpu.trace_stop"() : () -> ()
    %101 = tpu.reciprocal %98 {approx = true} : vector<8x8x1xf32> -> vector<8x8x1xf32>
    %102 = vector.broadcast %101 : vector<8x8x1xf32> to vector<8x8x4xf32>
    %103 = arith.mulf %100, %102 : vector<8x8x4xf32>
    %104 = vector.extract_strided_slice %103 {offsets = [0, 0, 0], sizes = [1, 8, 4], strides = [1, 1, 1]} : vector<8x8x4xf32> to vector<1x8x4xf32>
    %105 = vector.shape_cast %104 : vector<1x8x4xf32> to vector<8x4xf32>
    %c0_21 = arith.constant 0 : index
    %c0_22 = arith.constant 0 : index
    %106 = vector.load %arg11[%c0_21, %c0_22] : memref<8x32xf32, #tpu.memory_space<vmem>>, vector<8x4xf32>
    tpu.vector_store %arg11[%c0_21, %c0_22], %105 {strides = array<i32>} : memref<8x32xf32, #tpu.memory_space<vmem>>, vector<8x4xf32>,
    %107 = vector.extract_strided_slice %103 {offsets = [1, 0, 0], sizes = [1, 8, 4], strides = [1, 1, 1]} : vector<8x8x4xf32> to vector<1x8x4xf32>
    %108 = vector.shape_cast %107 : vector<1x8x4xf32> to vector<8x4xf32>
    %c0_23 = arith.constant 0 : index
    %c4 = arith.constant 4 : index
    %109 = vector.load %arg11[%c0_23, %c4] : memref<8x32xf32, #tpu.memory_space<vmem>>, vector<8x4xf32>
    tpu.vector_store %arg11[%c0_23, %c4], %108 {strides = array<i32>} : memref<8x32xf32, #tpu.memory_space<vmem>>, vector<8x4xf32>,
    %110 = vector.extract_strided_slice %103 {offsets = [2, 0, 0], sizes = [1, 8, 4], strides = [1, 1, 1]} : vector<8x8x4xf32> to vector<1x8x4xf32>
    %111 = vector.shape_cast %110 : vector<1x8x4xf32> to vector<8x4xf32>
    %c0_24 = arith.constant 0 : index
    %c8 = arith.constant 8 : index
    %112 = vector.load %arg11[%c0_24, %c8] : memref<8x32xf32, #tpu.memory_space<vmem>>, vector<8x4xf32>
    tpu.vector_store %arg11[%c0_24, %c8], %111 {strides = array<i32>} : memref<8x32xf32, #tpu.memory_space<vmem>>, vector<8x4xf32>,
    %113 = vector.extract_strided_slice %103 {offsets = [3, 0, 0], sizes = [1, 8, 4], strides = [1, 1, 1]} : vector<8x8x4xf32> to vector<1x8x4xf32>
    %114 = vector.shape_cast %113 : vector<1x8x4xf32> to vector<8x4xf32>
    %c0_25 = arith.constant 0 : index
    %c12 = arith.constant 12 : index
    %115 = vector.load %arg11[%c0_25, %c12] : memref<8x32xf32, #tpu.memory_space<vmem>>, vector<8x4xf32>
    tpu.vector_store %arg11[%c0_25, %c12], %114 {strides = array<i32>} : memref<8x32xf32, #tpu.memory_space<vmem>>, vector<8x4xf32>,
    %116 = vector.extract_strided_slice %103 {offsets = [4, 0, 0], sizes = [1, 8, 4], strides = [1, 1, 1]} : vector<8x8x4xf32> to vector<1x8x4xf32>
    %117 = vector.shape_cast %116 : vector<1x8x4xf32> to vector<8x4xf32>
    %c0_26 = arith.constant 0 : index
    %c16 = arith.constant 16 : index
    %118 = vector.load %arg11[%c0_26, %c16] : memref<8x32xf32, #tpu.memory_space<vmem>>, vector<8x4xf32>
    tpu.vector_store %arg11[%c0_26, %c16], %117 {strides = array<i32>} : memref<8x32xf32, #tpu.memory_space<vmem>>, vector<8x4xf32>,
    %119 = vector.extract_strided_slice %103 {offsets = [5, 0, 0], sizes = [1, 8, 4], strides = [1, 1, 1]} : vector<8x8x4xf32> to vector<1x8x4xf32>
    %120 = vector.shape_cast %119 : vector<1x8x4xf32> to vector<8x4xf32>
    %c0_27 = arith.constant 0 : index
    %c20 = arith.constant 20 : index
    %121 = vector.load %arg11[%c0_27, %c20] : memref<8x32xf32, #tpu.memory_space<vmem>>, vector<8x4xf32>
    tpu.vector_store %arg11[%c0_27, %c20], %120 {strides = array<i32>} : memref<8x32xf32, #tpu.memory_space<vmem>>, vector<8x4xf32>,
    %122 = vector.extract_strided_slice %103 {offsets = [6, 0, 0], sizes = [1, 8, 4], strides = [1, 1, 1]} : vector<8x8x4xf32> to vector<1x8x4xf32>
    %123 = vector.shape_cast %122 : vector<1x8x4xf32> to vector<8x4xf32>
    %c0_28 = arith.constant 0 : index
    %c24 = arith.constant 24 : index
    %124 = vector.load %arg11[%c0_28, %c24] : memref<8x32xf32, #tpu.memory_space<vmem>>, vector<8x4xf32>
    tpu.vector_store %arg11[%c0_28, %c24], %123 {strides = array<i32>} : memref<8x32xf32, #tpu.memory_space<vmem>>, vector<8x4xf32>,
    %125 = vector.extract_strided_slice %103 {offsets = [7, 0, 0], sizes = [1, 8, 4], strides = [1, 1, 1]} : vector<8x8x4xf32> to vector<1x8x4xf32>
    %126 = vector.shape_cast %125 : vector<1x8x4xf32> to vector<8x4xf32>
    %c0_29 = arith.constant 0 : index
    %c28 = arith.constant 28 : index
    %127 = vector.load %arg11[%c0_29, %c28] : memref<8x32xf32, #tpu.memory_space<vmem>>, vector<8x4xf32>
    tpu.vector_store %arg11[%c0_29, %c28], %126 {strides = array<i32>} : memref<8x32xf32, #tpu.memory_space<vmem>>, vector<8x4xf32>,
    %c0_30 = arith.constant 0 : index
    %c0_31 = arith.constant 0 : index
    %128 = vector.load %arg11[%c0_30, %c0_31] : memref<8x32xf32, #tpu.memory_space<vmem>>, vector<8x32xf32>
    %129 = arith.truncf %128 : vector<8x32xf32> to vector<8x32xbf16>
    %c0_32 = arith.constant 0 : index
    %c0_33 = arith.constant 0 : index
    %130 = vector.load %arg5[%c0_32, %c0_33] : memref<32x32xbf16, #tpu.memory_space<vmem>>, vector<32x32xbf16>
    %cst_34 = arith.constant dense<0.000000e+00> : vector<8x32xf32>
    %131 = tpu.matmul %129, %130, %cst_34 {dimension_numbers = #tpu.dot_dimension_numbers<[1], [0], [0], [1], [0, 0, 1, 1], [], []>} : vector<8x32xbf16>, vector<32x32xbf16>, vector<8x32xf32> -> vector<8x32xf32>
    %132 = vector.broadcast %7 : vector<1x32xf32> to vector<8x32xf32>
    %133 = arith.addf %131, %132 : vector<8x32xf32>
    %134 = arith.addf %1, %133 : vector<8x32xf32>
    %cst_35 = arith.constant dense<0.000000e+00> : vector<8xf32>
    %135 = vector.multi_reduction <add>, %134, %cst_35 [1] : vector<8x32xf32> to vector<8xf32>
    %136 = vector.shape_cast %135 : vector<8xf32> to vector<8x1xf32>
    %cst_36 = arith.constant 3.200000e+01 : f32
    %137 = vector.broadcast %cst_36 : f32 to vector<8x1xf32>
    %138 = arith.divf %136, %137 : vector<8x1xf32>
    %139 = vector.broadcast %138 : vector<8x1xf32> to vector<8x32xf32>
    %140 = arith.subf %134, %139 : vector<8x32xf32>
    %141 = arith.mulf %140, %140 : vector<8x32xf32>
    %cst_37 = arith.constant dense<0.000000e+00> : vector<8xf32>
    %142 = vector.multi_reduction <add>, %141, %cst_37 [1] : vector<8x32xf32> to vector<8xf32>
    %143 = vector.shape_cast %142 : vector<8xf32> to vector<8x1xf32>
    %cst_38 = arith.constant 3.200000e+01 : f32
    %144 = vector.broadcast %cst_38 : f32 to vector<8x1xf32>
    %145 = arith.divf %143, %144 : vector<8x1xf32>
    %146 = vector.broadcast %138 : vector<8x1xf32> to vector<8x32xf32>
    %147 = arith.subf %134, %146 : vector<8x32xf32>
    %cst_39 = arith.constant 9.99999974E-6 : f32
    %148 = vector.broadcast %cst_39 : f32 to vector<8x1xf32>
    %149 = arith.addf %145, %148 : vector<8x1xf32>
    %150 = math.rsqrt %149 : vector<8x1xf32>
    %151 = vector.broadcast %150 : vector<8x1xf32> to vector<8x32xf32>
    %152 = arith.mulf %147, %151 : vector<8x32xf32>
    %153 = vector.broadcast %8 : vector<1x32xf32> to vector<8x32xf32>
    %154 = arith.mulf %152, %153 : vector<8x32xf32>
    %155 = vector.broadcast %9 : vector<1x32xf32> to vector<8x32xf32>
    %156 = arith.addf %154, %155 : vector<8x32xf32>
    %157 = arith.truncf %156 : vector<8x32xf32> to vector<8x32xbf16>
    %c0_40 = arith.constant 0 : index
    %c0_41 = arith.constant 0 : index
    %158 = vector.load %arg6[%c0_40, %c0_41] : memref<32x64xbf16, #tpu.memory_space<vmem>>, vector<32x64xbf16>
    %cst_42 = arith.constant dense<0.000000e+00> : vector<8x64xf32>
    %159 = tpu.matmul %157, %158, %cst_42 {dimension_numbers = #tpu.dot_dimension_numbers<[1], [0], [0], [1], [0, 0, 1, 1], [], []>} : vector<8x32xbf16>, vector<32x64xbf16>, vector<8x64xf32> -> vector<8x64xf32>
    %160 = vector.broadcast %13 : vector<1x64xf32> to vector<8x64xf32>
    %161 = arith.addf %159, %160 : vector<8x64xf32>
    %cst_43 = arith.constant 0.000000e+00 : f32
    %162 = vector.broadcast %cst_43 : f32 to vector<8x64xf32>
    %163 = arith.maximumf %161, %162 : vector<8x64xf32>
    %164 = arith.truncf %163 : vector<8x64xf32> to vector<8x64xbf16>
    %c0_44 = arith.constant 0 : index
    %c0_45 = arith.constant 0 : index
    %165 = vector.load %arg7[%c0_44, %c0_45] : memref<64x32xbf16, #tpu.memory_space<vmem>>, vector<64x32xbf16>
    %cst_46 = arith.constant dense<0.000000e+00> : vector<8x32xf32>
    %166 = tpu.matmul %164, %165, %cst_46 {dimension_numbers = #tpu.dot_dimension_numbers<[1], [0], [0], [1], [0, 0, 1, 1], [], []>} : vector<8x64xbf16>, vector<64x32xbf16>, vector<8x32xf32> -> vector<8x32xf32>
    %167 = vector.broadcast %10 : vector<1x32xf32> to vector<8x32xf32>
    %168 = arith.addf %166, %167 : vector<8x32xf32>
    %169 = arith.addf %156, %168 : vector<8x32xf32>
    %cst_47 = arith.constant dense<0.000000e+00> : vector<8xf32>
    %170 = vector.multi_reduction <add>, %169, %cst_47 [1] : vector<8x32xf32> to vector<8xf32>
    %171 = vector.shape_cast %170 : vector<8xf32> to vector<8x1xf32>
    %cst_48 = arith.constant 3.200000e+01 : f32
    %172 = vector.broadcast %cst_48 : f32 to vector<8x1xf32>
    %173 = arith.divf %171, %172 : vector<8x1xf32>
    %174 = vector.broadcast %173 : vector<8x1xf32> to vector<8x32xf32>
    %175 = arith.subf %169, %174 : vector<8x32xf32>
    %176 = arith.mulf %175, %175 : vector<8x32xf32>
    %cst_49 = arith.constant dense<0.000000e+00> : vector<8xf32>
    %177 = vector.multi_reduction <add>, %176, %cst_49 [1] : vector<8x32xf32> to vector<8xf32>
    %178 = vector.shape_cast %177 : vector<8xf32> to vector<8x1xf32>
    %cst_50 = arith.constant 3.200000e+01 : f32
    %179 = vector.broadcast %cst_50 : f32 to vector<8x1xf32>
    %180 = arith.divf %178, %179 : vector<8x1xf32>
    %181 = vector.broadcast %173 : vector<8x1xf32> to vector<8x32xf32>
    %182 = arith.subf %169, %181 : vector<8x32xf32>
    %cst_51 = arith.constant 9.99999974E-6 : f32
    %183 = vector.broadcast %cst_51 : f32 to vector<8x1xf32>
    %184 = arith.addf %180, %183 : vector<8x1xf32>
    %185 = math.rsqrt %184 : vector<8x1xf32>
    %186 = vector.broadcast %185 : vector<8x1xf32> to vector<8x32xf32>
    %187 = arith.mulf %182, %186 : vector<8x32xf32>
    %188 = vector.broadcast %11 : vector<1x32xf32> to vector<8x32xf32>
    %189 = arith.mulf %187, %188 : vector<8x32xf32>
    %190 = vector.broadcast %12 : vector<1x32xf32> to vector<8x32xf32>
    %191 = arith.addf %189, %190 : vector<8x32xf32>
    %c0_52 = arith.constant 0 : index
    %c0_53 = arith.constant 0 : index
    %c0_54 = arith.constant 0 : index
    %192 = vector.load %arg10[%c0_52, %c0_53, %c0_54] : memref<1x8x32xf32, #tpu.memory_space<vmem>>, vector<1x8x32xf32>
    %193 = vector.shape_cast %192 : vector<1x8x32xf32> to vector<8x32xf32>
    %194 = vector.shape_cast %191 : vector<8x32xf32> to vector<1x8x32xf32>
    tpu.vector_store %arg10[%c0_52, %c0_53, %c0_54], %194 {strides = array<i32>} : memref<1x8x32xf32, #tpu.memory_space<vmem>>, vector<1x8x32xf32>,
    return
  }
  func.func @transform_0(%arg0: i32) -> (i32, i32, i32) {
    %c0_i32 = arith.constant 0 : i32
    %c0_i32_0 = arith.constant 0 : i32
    %c0_i32_1 = arith.constant 0 : i32
    return %arg0, %c0_i32, %c0_i32_0 : i32, i32, i32
  }
  func.func @transform_1(%arg0: i32) -> (i32, i32) {
    %c0_i32 = arith.constant 0 : i32
    %c0_i32_0 = arith.constant 0 : i32
    %c0_i32_1 = arith.constant 0 : i32
    return %c0_i32, %c0_i32_0 : i32, i32
  }
  func.func @transform_2(%arg0: i32) -> (i32, i32) {
    %c0_i32 = arith.constant 0 : i32
    %c0_i32_0 = arith.constant 0 : i32
    %c0_i32_1 = arith.constant 0 : i32
    return %c0_i32, %c0_i32_0 : i32, i32
  }
  func.func @transform_3(%arg0: i32) -> (i32, i32) {
    %c0_i32 = arith.constant 0 : i32
    %c0_i32_0 = arith.constant 0 : i32
    %c0_i32_1 = arith.constant 0 : i32
    return %c0_i32, %c0_i32_0 : i32, i32
  }
  func.func @transform_4(%arg0: i32) -> (i32, i32) {
    %c0_i32 = arith.constant 0 : i32
    %c0_i32_0 = arith.constant 0 : i32
    %c0_i32_1 = arith.constant 0 : i32
    return %c0_i32, %c0_i32_0 : i32, i32
  }
  func.func @transform_5(%arg0: i32) -> (i32, i32) {
    %c0_i32 = arith.constant 0 : i32
    %c0_i32_0 = arith.constant 0 : i32
    %c0_i32_1 = arith.constant 0 : i32
    return %c0_i32, %c0_i32_0 : i32, i32
  }
  func.func @transform_6(%arg0: i32) -> (i32, i32) {
    %c0_i32 = arith.constant 0 : i32
    %c0_i32_0 = arith.constant 0 : i32
    %c0_i32_1 = arith.constant 0 : i32
    return %c0_i32, %c0_i32_0 : i32, i32
  }
  func.func @transform_7(%arg0: i32) -> (i32, i32) {
    %c0_i32 = arith.constant 0 : i32
    %c0_i32_0 = arith.constant 0 : i32
    %c0_i32_1 = arith.constant 0 : i32
    return %c0_i32, %c0_i32_0 : i32, i32
  }
  func.func @transform_8(%arg0: i32) -> (i32, i32) {
    %c0_i32 = arith.constant 0 : i32
    %c0_i32_0 = arith.constant 0 : i32
    %c0_i32_1 = arith.constant 0 : i32
    return %c0_i32, %c0_i32_0 : i32, i32
  }
  func.func @transform_9(%arg0: i32) -> (i32, i32, i32) {
    %c0_i32 = arith.constant 0 : i32
    %c0_i32_0 = arith.constant 0 : i32
    %c0_i32_1 = arith.constant 0 : i32
    return %arg0, %c0_i32, %c0_i32_0 : i32, i32, i32
  }
}

</mosaic_0001>

<bundles_post_ra>
// kernel: decoder_block.1
= control target key start
LH: loop header
LB: loop body
LE: loop exit
PB: predicated region body
PF: predicated region fallthrough
CT: control target
= control target key end

     0   :  { %s2215_s0 = inlined_call_operand.vmem [shape: f32[2,8,32], index: 0, kind: input, shape index: {}]   ;;  %s2216_s1 = inlined_call_operand.vmem [shape: bf16[32,32], index: 1, kind: input, shape index: {}]   ;;  %s2217_s2 = inlined_call_operand.vmem [shape: bf16[32,32], index: 2, kind: input, shape index: {}]   ;;  %s2218_s3 = inlined_call_operand.hbm [shape: bf16[32,32], index: 3, kind: input, shape index: {}]   ;;  %s2219_s4 = inlined_call_operand.hbm [shape: bf16[32,32], index: 4, kind: input, shape index: {}]   ;;  %s2220_s5 = inlined_call_operand.hbm [shape: bf16[32,64], index: 5, kind: input, shape index: {}]   ;;  %s2221_s6 = inlined_call_operand.vmem [shape: bf16[64,32], index: 6, kind: input, shape index: {}]   ;;  %s2222_s7 = inlined_call_operand.hbm [shape: f32[9,32], index: 7, kind: input, shape index: {}]   ;;  %s2223_s8 = inlined_call_operand.hbm [shape: f32[1,64], index: 8, kind: input, shape index: {}]   ;;  %s2224_s9 = inlined_call_operand.hbm [shape: f32[2,8,32], index: 9, kind: output, shape index: {}]  }
   0x1   :  { %2230 = sst [smem:[#allocation22_spill]] %s2219_s4 }
   0x2   :  { %2231 = sst [smem:[#allocation23_spill]] %s2222_s7 }
   0x3   :  { %14 = vsyncpa [#allocation4], 0 }
   0x4   :  { %15 = vsyncpa [#allocation7], 0 }
   0x5   :  { %16 = vsyncpa [#allocation10], 0 }
   0x6   :  { %17 = vsyncpa [#allocation5], 0 }
   0x7   :  { %19 = vsyncpa [#allocation5 + $0x1], 0  ;;  %s1935_s30 = smov 0   ;;  %s1937_s10 = smov 0  }
   0x8   :  { %s1939_s11 = smov 0   ;;  %s1941_s12 = smov 0  }
   0x9 LB: > { %2232 = sst [smem:[#allocation17_spill]] %s1846_s30  ;;  %s1956_s13 = sadd.s32 4294967295, %s1858_s12   ;;  %s1858_s12 = sphi %s1941_s12, %s2245_s12   ;;  %s1854_s11 = sphi %s1939_s11, %s2247_s11   ;;  %s1850_s10 = sphi %s1937_s10, %s2249_s10   ;;  %s1846_s30 = sphi %s1935_s30, %s2248_s30  }
   0xa   : > { %2233 = sst [smem:[#allocation18_spill]] %s1854_s11  ;;  %s1362_s14 = sadd.s32 4294967294, %s1858_s12  }
   0xb   : > { %s1960_s15 = sadd.s32 1, %s1858_s12   ;;  %s226_s16 = sadd.s32 1, %s1854_s11 }
   0xc   : > { %2234 = sst [smem:[#allocation19_spill]] %s1960_s15  ;;  %s223_s17 = ssub.s32 %s1858_s12, %s1960_s15 }
   0xd   : > { %p236_p0 = scmp.ne.s32.totalorder %s1854_s11, %s1850_s10  ;;  %p224_p1 = scmp.eq.s32.totalorder %s223_s17, 0 }
   0xe   : > { %p237_p2 = scmp.eq.s32.totalorder %s1956_s13, 1  ;;  %p242_p3 = scmp.ne.s32.totalorder %s1850_s10, %s1846_s30 }
   0xf   : > { %p243_p4 = scmp.eq.s32.totalorder %s1362_s14, 1  ;;  %p1363_p7 = scmp.ge.s32.totalorder %s1858_s12, 1 }
  0x10   : > { %s1971_s18 = scalar_select %p224_p1, %s1854_s11, %s226_s16  }
  0x11   : > { %p1973_p5 = por %p237_p2, %p236_p0  ;;  %p1977_p6 = por %p243_p4, %p242_p3 }
  0x12   : > { %2235 = sst [smem:[#allocation20_spill]] %s1971_s18  ;;  %p250_p8 = scmp.lt.s32.totalorder %s1858_s12, 3 }
  0x13   : > { %s2237_s20 = scalar_select %p1977_p6, 1, 0 }
  0x14   : > { %p1516_p9 = scmp.eq.s32.totalorder %s1956_s13, 0  ;;  %p1984_p10 = pnand %p1363_p7, %p250_p8 }
  0x15   : > { %2238 = sst [smem:[#allocation21_spill]] %s2237_s20  ;;  %s1860_s29 = smov [#allocation6]  }
  0x16   : > { %s2240_s4 = sld [smem:[#allocation22_spill]]  ;;  %p1496_p11 = pneg %p1984_p10 }
  0x17   : > { %s2241_s7 = sld [smem:[#allocation23_spill]]  ;;  %s283_s14 = sshll.u32 %s1860_s29, 4  ;;  %s284_s14 = int_to_ptr.vmem [resolvable:$true] %s283_s14 }
  0x18   : > { %p1998_p12 = pnand %p1516_p9, %p1496_p11  ;;  %s1861_s16 = smov 64  }
  0x19   : > { %s1862_s17 = smov 4   ;;  %s1863_s22 = smov [#allocation9]  }
  0x1a   : > { %s314_s23 = sshll.u32 %s1863_s22, 4  ;;  %s1864_s25 = smov 128   ;;  %s315_s23 = int_to_ptr.vmem [resolvable:$true] %s314_s23 }
  0x1b   : > { %s1865_s26 = smov 8   ;;  %s267_s18 = sshll.u32 %s2218_s3, 4  ;;  %s268_s18 = int_to_ptr.hbm [resolvable:$true] %s267_s18 }
  0x1c   : > { %s281_s24 = sshll.u32 %s2240_s4, 4  ;;  %s1866_s29 = smov [#allocation3]   ;;  %s282_s24 = int_to_ptr.hbm [resolvable:$true] %s281_s24 }
  0x1d   : > { %s312_s27 = sshll.u32 %s2241_s7, 4  ;;  %s269_s11 = sshll.u32 %s1866_s29, 4  ;;  %s313_s27 = int_to_ptr.hbm [resolvable:$true] %s312_s27  ;;  %s270_s11 = int_to_ptr.vmem [resolvable:$true] %s269_s11 }
  0x1e   : > { %1502 = dma.hbm_to_vmem [thread:$0]  (!%p1998_p12), %s282_s24, 256, %s284_s14, [#allocation7], %s1861_s16, %s1861_s16, %s1862_s17  }
  0x1f   : > { %1508 = dma.hbm_to_vmem [thread:$0]  (!%p1998_p12), %s313_s27, 256, %s315_s23, [#allocation10], %s1864_s25, %s1864_s25, %s1865_s26  }
  0x20   : > { %s295_s24 = sshll.u32 %s2220_s5, 4  ;;  %s1867_s14 = smov [#allocation8]   ;;  %s296_s24 = int_to_ptr.hbm [resolvable:$true] %s295_s24 }
  0x21   : > { %1499 = dma.hbm_to_vmem [thread:$0]  (!%p1998_p12), %s268_s18, 256, %s270_s11, [#allocation4], %s1861_s16, %s1861_s16, %s1862_s17  }
  0x22   : > { %s297_s22 = sshll.u32 %s1867_s14, 4  ;;  %s327_s23 = sshll.u32 %s2223_s8, 4  ;;  %s298_s22 = int_to_ptr.vmem [resolvable:$true] %s297_s22  ;;  %s328_s23 = int_to_ptr.hbm [resolvable:$true] %s327_s23 }
  0x23   : > { %1505 = dma.hbm_to_vmem [thread:$0]  (!%p1998_p12), %s296_s24, 256, %s298_s22, [#allocation7], %s1861_s16, %s1861_s16, %s1862_s17  }
  0x24   : > { %s1868_s4 = smov [#allocation11]   ;;  %349 = sbr.rel (%p1984_p10) target bundleno = 1813 (0x715), region = 56 }
  0x25   : > { %s329_s7 = sshll.u32 %s1868_s4, 4  ;;  %s330_s7 = int_to_ptr.vmem [resolvable:$true] %s329_s7 }
  0x26   : > { %1511 = dma.hbm_to_vmem [thread:$0]  (!%p1998_p12), %s328_s23, 16, %s330_s7, [#allocation10]  }
  0x29   : > { %1829 = dma.done.wait (%p1516_p9), [#allocation4], 256  }
  0x2a   : > { %1831 = vsyncadd (%p1516_p9), [#allocation4], 4294967040 }
  0x2b   : > { %1833 = dma.done.wait (%p1516_p9), [#allocation7], 512  }
  0x2c   : > { %1835 = vsyncadd (%p1516_p9), [#allocation7], 4294966784 }
  0x2d   : > { %1837 = dma.done.wait (%p1516_p9), [#allocation10], 272  }
  0x2e   : > { %1839 = vsyncadd (%p1516_p9), [#allocation10], 4294967024  ;;  %p405_p13 = scmp.lt.s32.totalorder %s1956_s13, 1  ;;  %v1461_v0 = vld [vmem:[%s2216_s1 + $0x8] sm:$0xff]  ;;  %v1460_v2 = vld [vmem:[%s2216_s1] sm:$0xff]  ;;  %vm432_vm0 = vcmask 261120   ;;  %v600_v48 = vlaneseq }
  0x2f   : > { %v1463_v1 = vld [vmem:[%s2217_s2 + $0x8] sm:$0xff]  ;;  %v1465_v3 = vld [vmem:[#allocation3 + $0x8] sm:$0xff]  ;;  %442 = vmatpush.bf16.msra.mxu0 %v1461_v0  ;;  %v1462_v4 = vld [vmem:[%s2217_s2] sm:$0xff]  ;;  %vm606_vm1 = vcmask 31744   ;;  %s1869_s14 = smov 100   ;;  %s1870_s22 = smov 120  }
  0x30   : > { %s406_s30 = scalar_select %p405_p13, %s1956_s13, 1  ;;  %472 = vmatpush.bf16.msra.mxu1 %v1463_v1  ;;  %502 = vmatpush.bf16.msra.mxu2 %v1465_v3  ;;  %v1464_v6 = vld [vmem:[#allocation3] sm:$0xff]  ;;  %v2059_v8 = vld [vmem:[#allocation9] sm:$0xff]  ;;  %vm843_vm2 = vcmask 1043456   ;;  %v601_v53 = vshrl.u32 %v600_v48, 7  ;;  %v603_v54 = vand.u32 127, %v600_v48 }
  0x31   : > { %v419_v9 = vperm.slane %v2059_v8, 0  ;;  %v453_v10 = vperm.slane %v2059_v8, 1  ;;  %s1871_s27 = smov 116   ;;  %s1872_s23 = smov 112   ;;  %v483_v22 = vperm.slane %v2059_v8, 2  ;;  %vm759_vm4 = vcmask 64512  }
  0x32   : > { %s1377_s11 = sshll.u32 %s406_s30, 3  ;;  %s1873_s4 = smov 124   ;;  %vm604_vm3 = vcmp.le.s32.totalorder %v603_v54, %v601_v53  ;;  %v1876_v59 = vmov -1e+30   ;;  %vm1014_vm5 = vcmask 64544   ;;  %vm1020_vm6 = vcmask 97344  }
  0x33   : > { %s408_s20 = scalar_lea.vmem %s2215_s0, %s1377_s11  ;;  %443 = vmatpush.bf16.msra.mxu0 %v1460_v2  ;;  %s1874_s7 = smov 108   ;;  %v2094_v60 = vsel %vm604_vm3, 0.0, %v1876_v59  ;;  %vm1026_vm7 = vcmask 130144   ;;  %vm1032_vm8 = vcmask 162944   ;;  %vm1038_vm9 = vcmask 195744  }
  0x34   : > { %v2052_v5 = vld [vmem:[%s408_s20] sm:$0xff]  ;;  %473 = vmatpush.bf16.msra.mxu1 %v1462_v4  ;;  %503 = vmatpush.bf16.msra.mxu2 %v1464_v6  ;;  %s1875_s30 = smov 104   ;;  %s1877_s11 = smov 4   ;;  %vm1044_vm10 = vcmask 228544   ;;  %vm1050_vm11 = vcmask 261344  }
  0x35   : > { %v411_v7 = vpack.c.bf16 %v2052_v5, %v2052_v5  ;;  %s1878_s15 = smov 12   ;;  %s1879_s18 = smov 8  }
  0x36   : > { %s1880_s20 = smov 16   ;;  %s1881_s21 = smov 24  }
  0x37   : > { %1386 = vmatmul.msk.bf16.vlgmr.msra.gmra.mxu0 %vm432_vm0, %v411_v7  ;;  %1395 = vmatmul.msk.bf16.vlgmr.msra.gmra.mxu1 %vm432_vm0, %v411_v7  ;;  %s1882_s28 = smov 28   ;;  %s1883_s16 = smov 20  }
  0x38   : > { %1404 = vmatmul.msk.bf16.vlgmr.msra.gmra.mxu2 %vm432_vm0, %v411_v7  ;;  %s1804_s26 = scalar_lea.hbm %s2224_s9, 16 }
  0xb4   : > { %v445_v11 = vpop.f32.mrf.mxu0  ;;  %v475_v12 = vpop.f32.mrf.mxu1 }
  0xb5   : > { %v446_v13 = vadd.f32 %v445_v11, %v419_v9  ;;  %v476_v14 = vadd.f32 %v475_v12, %v453_v10 }
  0xb7   : > { %v509_v15 = vmul.f32 0.5, %v446_v13  ;;  %559 = vrot.lane.b32.xlu2 %v476_v14, %s1869_s14  ;;  %544 = vrot.lane.b32.xlu1 %v476_v14, %s1870_s22  ;;  %v562_v16 = vpack.c.bf16 %v476_v14, %v476_v14 }
  0xb9   : > { %v611_v17 = vsel %vm606_vm1, %v562_v16, 0  ;;  %v1584_v18 = vpack.i.bf16 %v509_v15, %v476_v14  ;;  %v532_v21 = vpack.c.bf16 %v509_v15, %v509_v15 }
  0xba   : > { %620 = vmatpush.bf16.xpose.msra.mxu3 %v611_v17 }
  0xbb   : > { %1585 = vrot.lane.b32.xlu0 %v1584_v18, %s1871_s27  ;;  %v505_v23 = vpop.f32.mrf.mxu2 }
  0xbc   : > { %v447_v19 = vpop.f32.mrf.mxu0  ;;  %v477_v20 = vpop.f32.mrf.mxu1  ;;  %v2074_v24 = vadd.f32 %v505_v23, %v483_v22 }
  0xbe   : > { %v592_v39 = vpack.c.bf16 %v2074_v24, %v2074_v24 }
  0xbf   : > { %550 = vrot.lane.b32.xlu1 %v476_v14, %s1872_s23  ;;  %514 = vrot.lane.b32.xlu2 %v509_v15, %s1870_s22 }
  0xc0   : > { %v845_v44 = vsel %vm843_vm2, %v592_v39, 0 }
  0xc1   : > { %1405 = vmatmul.msk.bf16.vlgmr.msra.gmra.mxu3 %vm606_vm1, %v532_v21 }
  0xc3   : > { %1590 = vrot.lane.b32.xlu0 %v1584_v18, %s1873_s4  ;;  %v507_v25 = vpop.f32.mrf.mxu2 }
  0xc7   : > { %529 = vrot.lane.b32.xlu1 %v509_v15, %s1869_s14  ;;  %553 = vrot.lane.b32.xlu2 %v476_v14, %s1874_s7 }
  0xcb   : > { %520 = vrot.lane.b32.xlu0 %v509_v15, %s1872_s23 }
  0xcf   : > { %523 = vrot.lane.b32.xlu1 %v509_v15, %s1874_s7  ;;  %526 = vrot.lane.b32.xlu2 %v509_v15, %s1875_s30 }
  0xd3   : > { %556 = vrot.lane.b32.xlu0 %v476_v14, %s1875_s30 }
  0xd7   : > { %571 = vrot.lane.b32.xlu1 %v2074_v24, %s1873_s4  ;;  %574 = vrot.lane.b32.xlu2 %v2074_v24, %s1870_s22 }
  0xdb   : > { %577 = vrot.lane.b32.xlu0 %v2074_v24, %s1871_s27 }
  0xe3   : > { %580 = vrot.lane.b32.xlu0 %v2074_v24, %s1872_s23  ;;  %s402_s23 = sand.u32 1, %s1850_s10  }
  0xe4   : > { %s1376_s4 = sshll.u32 %s402_s23, 3 }
 0x111   : > { %v560_v26 = vpop.permute.xlu2 %559 }
 0x112   : > { %v569_v33 = vpack.c.bf16 %v560_v26, %v560_v26 }
 0x114   : > { %v744_v40 = vsel %vm606_vm1, %v569_v33, 0 }
 0x119   : > { %v515_v28 = vpop.permute.xlu2 %514 }
 0x11a   : > { %v534_v35 = vpack.c.bf16 %v515_v28, %v515_v28 }
 0x121   : > { %v554_v41 = vpop.permute.xlu2 %553 }
 0x122   : > { %v567_v47 = vpack.c.bf16 %v554_v41, %v554_v41 }
 0x124   : > { %v706_v52 = vsel %vm606_vm1, %v567_v47, 0 }
 0x129   : > { %v545_v27 = vpop.permute.xlu1 %544  ;;  %v527_v6 = vpop.permute.xlu2 %526 }
 0x12a   : > { %v564_v29 = vpack.c.bf16 %v545_v27, %v545_v27  ;;  %v538_v10 = vpack.c.bf16 %v527_v6, %v527_v6 }
 0x12c   : > { %v649_v30 = vsel %vm606_vm1, %v564_v29, 0 }
 0x12d   : > { %658 = vmatpush.bf16.xpose.msrb.mxu1 %v649_v30  ;;  %v1586_v31 = vpop.permute.xlu0 %1585 }
 0x12e   : > { %v1587_v32 = vunpack.i.l.bf16 %v1586_v31  ;;  %v1588_v42 = vunpack.i.h.bf16 %v1586_v31 }
 0x130   : > { %v565_v34 = vpack.c.bf16 %v1587_v32, %v1587_v32  ;;  %v535_v49 = vpack.c.bf16 %v1588_v42, %v1588_v42 }
 0x131   : > { %v551_v36 = vpop.permute.xlu1 %550  ;;  %v575_v47 = vpop.permute.xlu2 %574 }
 0x132   : > { %v566_v37 = vpack.c.bf16 %v551_v36, %v551_v36  ;;  %v668_v38 = vsel %vm606_vm1, %v565_v34, 0 }
 0x133   : > { %677 = vmatpush.bf16.xpose.msrb.mxu2 %v668_v38 }
 0x134   : > { %1407 = vmatmul.msk.bf16.vlgmr.msrb.gmra.mxu1 %vm606_vm1, %v534_v35  ;;  %v687_v43 = vsel %vm606_vm1, %v566_v37, 0 }
 0x135   : > { %696 = vmatpush.bf16.xpose.msrb.mxu3 %v687_v43  ;;  %v1591_v45 = vpop.permute.xlu0 %1590 }
 0x136   : > { %v1592_v46 = vunpack.i.l.bf16 %v1591_v45  ;;  %v1593_v55 = vunpack.i.h.bf16 %v1591_v45 }
 0x138   : > { %v563_v50 = vpack.c.bf16 %v1592_v46, %v1592_v46  ;;  %v533_v58 = vpack.c.bf16 %v1593_v55, %v1593_v55 }
 0x139   : > { %v530_v61 = vpop.permute.xlu1 %529 }
 0x13a   : > { %1408 = vmatmul.msk.bf16.vlgmr.msrb.gmra.mxu2 %vm606_vm1, %v535_v49  ;;  %v630_v51 = vsel %vm606_vm1, %v563_v50, 0  ;;  %v539_v3 = vpack.c.bf16 %v530_v61, %v530_v61  ;;  %v594_v49 = vpack.c.bf16 %v575_v47, %v575_v47 }
 0x13b   : > { %753 = vmatpush.bf16.xpose.msra.mxu2 %v744_v40  ;;  %639 = vmatpush.bf16.xpose.msrb.mxu0 %v630_v51 }
 0x13c   : > { %v883_v54 = vsel %vm843_vm2, %v594_v49, 0 }
 0x13d   : > { %854 = vmatpush.bf16.msra.mxu3 %v845_v44  ;;  %v521_v56 = vpop.permute.xlu0 %520 }
 0x13e   : > { %v536_v57 = vpack.c.bf16 %v521_v56, %v521_v56 }
 0x140   : > { %1409 = vmatmul.msk.bf16.vlgmr.msrb.gmra.mxu3 %vm606_vm1, %v536_v57 }
 0x141   : > { %v524_v9 = vpop.permute.xlu1 %523 }
 0x142   : > { %1406 = vmatmul.msk.bf16.vlgmr.msrb.gmra.mxu0 %vm606_vm1, %v533_v58  ;;  %v537_v11 = vpack.c.bf16 %v524_v9, %v524_v9 }
 0x143   : > { %715 = vmatpush.bf16.xpose.msra.mxu0 %v706_v52 }
 0x144   : > { %v622_v62 = vpop.f32.mrf.mxu3 }
 0x145   : > { %v623_v63 = vadd.f32 %v622_v62, %v2094_v60  ;;  %v557_v0 = vpop.permute.xlu0 %556 }
 0x146   : > { %v568_v1 = vpack.c.bf16 %v557_v0, %v557_v0 }
 0x147   : > { %v760_v2 = vsel %vm759_vm4, %v623_v63, -inf }
 0x148   : > { %v725_v4 = vsel %vm606_vm1, %v568_v1, 0  ;;  %761 = vmax.xlane.f32.xlu0 %v760_v2 }
 0x149   : > { %734 = vmatpush.bf16.xpose.msra.mxu1 %v725_v4  ;;  %v572_v48 = vpop.permute.xlu1 %571 }
 0x14a   : > { %1412 = vmatmul.msk.bf16.vlgmr.msra.gmra.mxu2 %vm606_vm1, %v539_v3  ;;  %v593_v50 = vpack.c.bf16 %v572_v48, %v572_v48 }
 0x14c   : > { %v624_v7 = vpop.f32.mrf.mxu3  ;;  %v864_v55 = vsel %vm843_vm2, %v593_v50, 0 }
 0x14d   : > { %v578_v12 = vpop.permute.xlu0 %577  ;;  %873 = vmatpush.bf16.msrb.mxu0 %v864_v55 }
 0x14e   : > { %v595_v13 = vpack.c.bf16 %v578_v12, %v578_v12 }
 0x150   : > { %1411 = vmatmul.msk.bf16.vlgmr.msra.gmra.mxu1 %vm606_vm1, %v538_v10  ;;  %v902_v14 = vsel %vm843_vm2, %v595_v13, 0 }
 0x151   : > { %911 = vmatpush.bf16.msrb.mxu2 %v902_v14  ;;  %892 = vmatpush.bf16.msrb.mxu1 %v883_v54 }
 0x152   : > { %1410 = vmatmul.msk.bf16.vlgmr.msra.gmra.mxu0 %vm606_vm1, %v537_v11 }
 0x155   : > { %v581_v15 = vpop.permute.xlu0 %580 }
 0x156   : > { %v596_v16 = vpack.c.bf16 %v581_v15, %v581_v15 }
 0x158   : > { %v921_v17 = vsel %vm843_vm2, %v596_v16, 0 }
 0x159   : > { %930 = vmatpush.bf16.msrb.mxu3 %v921_v17 }
 0x1b1   : > { %v660_v18 = vpop.f32.mrf.mxu1 }
 0x1b2   : > { %v661_v34 = vadd.f32 %v660_v18, %v2094_v60 }
 0x1b4   : > { %v766_v38 = vsel %vm759_vm4, %v661_v34, -inf }
 0x1b9   : > { %v662_v19 = vpop.f32.mrf.mxu1 }
 0x1bb   : > { %v762_v20 = vpop.xlane.xlu0 %761 }
 0x1bc   : > { %v784_v21 = vsub.f32 %v623_v63, %v762_v20 }
 0x1bd   : > { %v679_v22 = vpop.f32.mrf.mxu2 }
 0x1be   : > { %v792_v23 = vmul.f32 1.442695, %v784_v21  ;;  %v680_v25 = vadd.f32 %v679_v22, %v2094_v60 }
 0x1bf   : > { %v641_v26 = vpop.f32.mrf.mxu0 }
 0x1c0   : > { %1596 = vpow2.f32 %v792_v23  ;;  %v642_v27 = vadd.f32 %v641_v26, %v2094_v60  ;;  %v769_v28 = vsel %vm759_vm4, %v680_v25, -inf }
 0x1c1   : > { %770 = vmax.xlane.f32.xlu1 %v769_v28 }
 0x1c2   : > { %v763_v29 = vsel %vm759_vm4, %v642_v27, -inf }
 0x1c3   : > { %764 = vmax.xlane.f32.xlu2 %v763_v29  ;;  %v698_v30 = vpop.f32.mrf.mxu3 }
 0x1c4   : > { %v699_v31 = vadd.f32 %v698_v30, %v2094_v60 }
 0x1c5   : > { %v681_v32 = vpop.f32.mrf.mxu2 }
 0x1c6   : > { %v2109_v33 = vpop.eup %1596  ;;  %v772_v35 = vsel %vm759_vm4, %v699_v31, -inf }
 0x1c7   : > { %v832_v36 = vpack.c.bf16 %v2109_v33, %v2109_v33  ;;  %v643_v37 = vpop.f32.mrf.mxu0  ;;  %773 = vmax.xlane.f32.xlu0 %v772_v35 }
 0x1c9   : > { %1413 = vmatmul.msk.bf16.vlgmr.msra.gmra.mxu3 %vm759_vm4, %v832_v36 }
 0x1cb   : > { %767 = vmax.xlane.f32.xlu2 %v766_v38  ;;  %v700_v39 = vpop.f32.mrf.mxu3 }
 0x1cd   : > { %v736_v40 = vpop.f32.mrf.mxu1  ;;  %v755_v41 = vpop.f32.mrf.mxu2 }
 0x1ce   : > { %v737_v42 = vadd.f32 %v736_v40, %v2094_v60  ;;  %v2122_v51 = vadd.f32 %v755_v41, %v2094_v60 }
 0x1cf   : > { %v717_v43 = vpop.f32.mrf.mxu0 }
 0x1d0   : > { %v718_v44 = vadd.f32 %v717_v43, %v2094_v60  ;;  %v778_v45 = vsel %vm759_vm4, %v737_v42, -inf  ;;  %v781_v57 = vsel %vm759_vm4, %v2122_v51, -inf }
 0x1d1   : > { %779 = vmax.xlane.f32.xlu1 %v778_v45 }
 0x1d2   : > { %v775_v46 = vsel %vm759_vm4, %v718_v44, -inf }
 0x1d3   : > { %776 = vmax.xlane.f32.xlu2 %v775_v46  ;;  %v808_v46 = vsel %vm759_vm4, %v2109_v33, 0.0 }
 0x1d5   : > { %v738_v52 = vpop.f32.mrf.mxu1  ;;  %v757_v53 = vpop.f32.mrf.mxu2 }
 0x1d7   : > { %v719_v56 = vpop.f32.mrf.mxu0 }
 0x1d9   : > { %782 = vmax.xlane.f32.xlu1 %v781_v57 }
 0x1db   : > { %586 = vrot.lane.b32.xlu0 %v2074_v24, %s1875_s30 }
 0x1eb   : > { %589 = vrot.lane.b32.xlu2 %v2074_v24, %s1869_s14 }
 0x1f2   : > { %583 = vrot.lane.b32.xlu1 %v2074_v24, %s1874_s7  ;;  %s1457_s7 = sshll.u32 %s1956_s13, 3  ;;  %s1238_s13 = scalar_lea.sflag [#allocation5], %s402_s23 }
 0x234   : > { %v771_v58 = vpop.xlane.xlu1 %770 }
 0x235   : > { %v787_v59 = vsub.f32 %v680_v25, %v771_v58 }
 0x236   : > { %v765_v60 = vpop.xlane.xlu2 %764 }
 0x237   : > { %v798_v61 = vmul.f32 1.442695, %v787_v59  ;;  %v785_v62 = vsub.f32 %v642_v27, %v765_v60 }
 0x239   : > { %1598 = vpow2.f32 %v798_v61  ;;  %v794_v63 = vmul.f32 1.442695, %v785_v62 }
 0x23a   : > { %v774_v0 = vpop.xlane.xlu0 %773 }
 0x23b   : > { %1600 = vpow2.f32 %v794_v63  ;;  %v788_v1 = vsub.f32 %v699_v31, %v774_v0 }
 0x23d   : > { %v800_v2 = vmul.f32 1.442695, %v788_v1 }
 0x23e   : > { %v768_v3 = vpop.xlane.xlu2 %767 }
 0x23f   : > { %v1599_v4 = vpop.eup %1598  ;;  %1602 = vpow2.f32 %v800_v2  ;;  %v786_v6 = vsub.f32 %v661_v34, %v768_v3 }
 0x240   : > { %v835_v7 = vpack.c.bf16 %v1599_v4, %v1599_v4  ;;  %v817_v9 = vsel %vm759_vm4, %v1599_v4, 0.0 }
 0x241   : > { %v1601_v10 = vpop.eup %1600  ;;  %v796_v24 = vmul.f32 1.442695, %v786_v6  ;;  %818 = vadd.xlane.f32.xlu1 %v817_v9 }
 0x242   : > { %v833_v11 = vpack.c.bf16 %v1601_v10, %v1601_v10  ;;  %1416 = vmatmul.msk.bf16.vlgmr.msrb.gmra.mxu2 %vm759_vm4, %v835_v7  ;;  %v811_v12 = vsel %vm759_vm4, %v1601_v10, 0.0 }
 0x243   : > { %1604 = vpow2.f32 %v796_v24  ;;  %812 = vadd.xlane.f32.xlu0 %v811_v12 }
 0x244   : > { %1414 = vmatmul.msk.bf16.vlgmr.msrb.gmra.mxu0 %vm759_vm4, %v833_v11  ;;  %v780_v13 = vpop.xlane.xlu1 %779 }
 0x245   : > { %v1603_v14 = vpop.eup %1602  ;;  %v790_v15 = vsub.f32 %v737_v42, %v780_v13 }
 0x246   : > { %v836_v16 = vpack.c.bf16 %v1603_v14, %v1603_v14  ;;  %v777_v17 = vpop.xlane.xlu2 %776  ;;  %v820_v25 = vsel %vm759_vm4, %v1603_v14, 0.0 }
 0x247   : > { %v804_v18 = vmul.f32 1.442695, %v790_v15  ;;  %v789_v19 = vsub.f32 %v718_v44, %v777_v17 }
 0x248   : > { %1417 = vmatmul.msk.bf16.vlgmr.msrb.gmra.mxu3 %vm759_vm4, %v836_v16 }
 0x249   : > { %v1605_v20 = vpop.eup %1604  ;;  %1606 = vpow2.f32 %v804_v18  ;;  %v802_v21 = vmul.f32 1.442695, %v789_v19 }
 0x24a   : > { %v834_v22 = vpack.c.bf16 %v1605_v20, %v1605_v20  ;;  %v814_v23 = vsel %vm759_vm4, %v1605_v20, 0.0 }
 0x24b   : > { %1608 = vpow2.f32 %v802_v21  ;;  %815 = vadd.xlane.f32.xlu2 %v814_v23  ;;  %821 = vadd.xlane.f32.xlu0 %v820_v25 }
 0x24c   : > { %1415 = vmatmul.msk.bf16.vlgmr.msrb.gmra.mxu1 %vm759_vm4, %v834_v22  ;;  %v783_v26 = vpop.xlane.xlu1 %782  ;;  %v2142_v27 = vpop.f32.mrf.mxu3 }
 0x24d   : > { %v791_v28 = vsub.f32 %v2122_v51, %v783_v26  ;;  %v587_v29 = vpop.permute.xlu0 %586 }
 0x24e   : > { %v598_v30 = vpack.c.bf16 %v587_v29, %v587_v29  ;;  %v590_v31 = vpop.permute.xlu2 %589 }
 0x24f   : > { %v1607_v32 = vpop.eup %1606  ;;  %v806_v34 = vmul.f32 1.442695, %v791_v28  ;;  %v599_v35 = vpack.c.bf16 %v590_v31, %v590_v31  ;;  %v1466_v31 = vld [vmem:[#allocation6] sm:$0xff] }
 0x250   : > { %v959_v36 = vsel %vm843_vm2, %v598_v30, 0  ;;  %v826_v40 = vsel %vm759_vm4, %v1607_v32, 0.0  ;;  %v838_v45 = vpack.c.bf16 %v1607_v32, %v1607_v32  ;;  %v1467_v30 = vld [vmem:[#allocation6 + $0x8] sm:$0xff] }
 0x251   : > { %v1609_v37 = vpop.eup %1608  ;;  %1610 = vpow2.f32 %v806_v34  ;;  %v978_v38 = vsel %vm843_vm2, %v599_v35, 0  ;;  %968 = vmatpush.bf16.msra.mxu1 %v959_v36  ;;  %1080 = vmatpush.bf16.msra.mxu3 %v1467_v30 }
 0x252   : > { %987 = vmatpush.bf16.msra.mxu2 %v978_v38  ;;  %v823_v39 = vsel %vm759_vm4, %v1609_v37, 0.0  ;;  %v837_v50 = vpack.c.bf16 %v1609_v37, %v1609_v37  ;;  %v1058_v38 = vperm.slane %v2059_v8, 3 }
 0x253   : > { %824 = vadd.xlane.f32.xlu2 %v823_v39  ;;  %827 = vadd.xlane.f32.xlu0 %v826_v40 }
 0x254   : > { %v858_v41 = vpop.f32.mrf.mxu3 }
 0x255   : > { %1081 = vmatpush.bf16.msra.mxu3 %v1466_v31 }
 0x257   : > { %v1611_v42 = vpop.eup %1610 }
 0x258   : > { %v839_v43 = vpack.c.bf16 %v1611_v42, %v1611_v42  ;;  %v829_v44 = vsel %vm759_vm4, %v1611_v42, 0.0 }
 0x259   : > { %830 = vadd.xlane.f32.xlu1 %v829_v44  ;;  %v1884_v44 = vmov 32.0  }
 0x25a   : > { %1420 = vmatmul.msk.bf16.vlgmr.msra.gmra.mxu2 %vm759_vm4, %v839_v43 }
 0x25b   : > { %809 = vadd.xlane.f32.xlu2 %v808_v46 }
 0x25c   : > { %1419 = vmatmul.msk.bf16.vlgmr.msra.gmra.mxu1 %vm759_vm4, %v838_v45 }
 0x264   : > { %v584_v47 = vpop.permute.xlu1 %583 }
 0x265   : > { %v597_v48 = vpack.c.bf16 %v584_v47, %v584_v47 }
 0x267   : > { %v940_v49 = vsel %vm843_vm2, %v597_v48, 0 }
 0x268   : > { %949 = vmatpush.bf16.msra.mxu0 %v940_v49 }
 0x26b   : > { %1418 = vmatmul.msk.bf16.vlgmr.msra.gmra.mxu0 %vm759_vm4, %v837_v50 }
 0x2b4   : > { %v819_v52 = vpop.xlane.xlu1 %818 }
 0x2b6   : > { %v813_v51 = vpop.xlane.xlu0 %812 }
 0x2b7   : > { %1612 = vrcp.f32 %v813_v51 }
 0x2b8   : > { %1614 = vrcp.f32 %v819_v52 }
 0x2bd   : > { %v1613_v54 = vpop.eup %1612 }
 0x2be   : > { %v816_v53 = vpop.xlane.xlu2 %815  ;;  %v822_v56 = vpop.xlane.xlu0 %821 }
 0x2bf   : > { %1616 = vrcp.f32 %v816_v53  ;;  %v1615_v57 = vpop.eup %1614 }
 0x2c0   : > { %1618 = vrcp.f32 %v822_v56  ;;  %v1468_v56 = vld [vmem:[#allocation8] sm:$0xff] }
 0x2c1   : > { %v875_v55 = vpop.f32.mrf.mxu0 }
 0x2c2   : > { %v1002_v33 = vmul.f32 %v1613_v54, %v875_v55 }
 0x2c4   : > { %1011 = vrot.lane.b32.xlu0 %v1002_v33, %s1877_s11  ;;  %v1473_v33 = vld [vmem:[%s2221_s6 + $0x18] sm:$0xff] }
 0x2c5   : > { %v913_v58 = vpop.f32.mrf.mxu2  ;;  %v1617_v61 = vpop.eup %1616  ;;  %1200 = vmatpush.bf16.msrb.mxu1 %v1473_v33 }
 0x2c6   : > { %v1004_v59 = vmul.f32 %v1615_v57, %v913_v58  ;;  %v825_v60 = vpop.xlane.xlu2 %824  ;;  %v1619_v1 = vpop.eup %1618 }
 0x2c7   : > { %v828_v7 = vpop.xlane.xlu0 %827 }
 0x2c8   : > { %1023 = vrot.lane.b32.xlu2 %v1004_v59, %s1878_s15  ;;  %v1472_v59 = vld [vmem:[%s2221_s6 + $0x10] sm:$0xff]  ;;  %s1248_s15 = scalar_lea.hbm %s2224_s9, %s1457_s7 }
 0x2c9   : > { %v877_v62 = vpop.f32.mrf.mxu0  ;;  %v894_v63 = vpop.f32.mrf.mxu1  ;;  %1201 = vmatpush.bf16.msrb.mxu1 %v1472_v59 }
 0x2ca   : > { %v1003_v0 = vmul.f32 %v1617_v61, %v894_v63 }
 0x2cb   : > { %v932_v2 = vpop.f32.mrf.mxu3 }
 0x2cc   : > { %v1005_v3 = vmul.f32 %v1619_v1, %v932_v2  ;;  %1017 = vrot.lane.b32.xlu1 %v1003_v0, %s1879_s18  ;;  %v831_v24 = vpop.xlane.xlu1 %830  ;;  %s404_s18 = scalar_lea.vmem [#allocation12], %s1376_s4 }
 0x2cd   : > { %v915_v4 = vpop.f32.mrf.mxu2 }
 0x2ce   : > { %v810_v6 = vpop.xlane.xlu2 %809  ;;  %1029 = vrot.lane.b32.xlu0 %v1005_v3, %s1880_s20  ;;  %v1117_v3 = vperm.slane %v2059_v8, 4  ;;  %s1250_s20 = sshll.u32 %s404_s18, 4  ;;  %s1251_s20 = int_to_ptr.vmem [resolvable:$true] %s1250_s20 }
 0x2cf   : > { %1620 = vrcp.f32 %v810_v6  ;;  %v1119_v6 = vperm.slane %v2059_v8, 5 }
 0x2d0   : > { %1622 = vrcp.f32 %v828_v7 }
 0x2d1   : > { %v896_v9 = vpop.f32.mrf.mxu1  ;;  %1624 = vrcp.f32 %v831_v24 }
 0x2d2   : > { %1626 = vrcp.f32 %v825_v60 }
 0x2d3   : > { %v934_v10 = vpop.f32.mrf.mxu3  ;;  %1628 = vrcp.f32 %v1884_v44  ;;  %v1595_v44 = vld [vmem:[#allocation9 + $0x8] ss:$0 sm:$0xff] }
 0x2d5   : > { %v1621_v11 = vpop.eup %1620 }
 0x2d6   : > { %v1001_v12 = vmul.f32 %v1621_v11, %v2142_v27  ;;  %v1623_v13 = vpop.eup %1622  ;;  %v1471_v11 = vld [vmem:[%s2221_s6 + $0x8] sm:$0xff] }
 0x2d7   : > { %v1625_v16 = vpop.eup %1624  ;;  %1202 = vmatpush.bf16.msrb.mxu1 %v1471_v11 }
 0x2d8   : > { %1009 = vst.msk [vmem:[#allocation2] sm:$0xff] %vm606_vm1, %v1001_v12  ;;  %v1627_v21 = vpop.eup %1626  ;;  %v1470_v12 = vld [vmem:[%s2221_s6] sm:$0xff]  ;;  %vm1192_vm1 = vcmask 523264  }
 0x2d9   : > { %v970_v14 = vpop.f32.mrf.mxu1  ;;  %v1629_v45 = vpop.eup %1628 }
 0x2da   : > { %v1007_v15 = vmul.f32 %v1623_v13, %v970_v14  ;;  %v1092_v46 = vmul.f32 32.0, %v1629_v45  ;;  %vm1096_vm12 = vweird.f32 %v1629_v45  ;;  %v1594_v13 = vld [vmem:[#allocation11] ss:$0 sm:$0xff] }
 0x2db   : > { %1203 = vmatpush.bf16.msrb.mxu1 %v1470_v12 }
 0x2dc   : > { %1041 = vrot.lane.b32.xlu0 %v1007_v15, %s1881_s21  ;;  %v1093_v47 = vsub.f32 1.0, %v1092_v46  ;;  %s1252_s21 = sshll.u32 %s1248_s15, 4  ;;  %s1253_s21 = int_to_ptr.hbm [resolvable:$true] %s1252_s21 }
 0x2dd   : > { %v989_v17 = vpop.f32.mrf.mxu2 }
 0x2de   : > { %v1008_v18 = vmul.f32 %v1625_v16, %v989_v17  ;;  %v1094_v48 = vmul.f32 %v1629_v45, %v1093_v47 }
 0x2e0   : > { %1047 = vrot.lane.b32.xlu2 %v1008_v18, %s1882_s28  ;;  %v1095_v49 = vadd.f32 %v1629_v45, %v1094_v48  ;;  %s1798_s28 = sshra.s32 %s1253_s21, 4  ;;  %s1799_s28 = int_to_ptr.hbm [resolvable:$true] %s1798_s28 }
 0x2e1   : > { %v972_v19 = vpop.f32.mrf.mxu1  ;;  %p1805_p3 = scmp.lt.s32.totalorder %s1799_s28, %s2224_s9 }
 0x2e2   : > { %v1097_v50 = vsel %vm1096_vm12, %v1629_v45, %v1095_v49  ;;  %v1167_v19 = vperm.slane %v2059_v8, 6 }
 0x2e5   : > { %v991_v20 = vpop.f32.mrf.mxu2 }
 0x2e8   : > { %v951_v22 = vpop.f32.mrf.mxu0 }
 0x2e9   : > { %v1006_v23 = vmul.f32 %v1627_v21, %v951_v22 }
 0x2eb   : > { %1035 = vrot.lane.b32.xlu1 %v1006_v23, %s1883_s16  ;;  %s1800_s16 = scalar_lea.hbm %s1799_s28, 8 }
 0x2ec   : > { %p1801_p0 = scmp.ne.s32.totalorder %s1799_s28, %s1800_s16  ;;  %p1806_p4 = scmp.lt.s32.totalorder %s1804_s26, %s1800_s16 }
 0x2ee   : > { %p1802_p1 = pnand %p1801_p0, %p1973_p5  ;;  %p1807_p7 = por %p1806_p4, %p1805_p3 }
 0x2f0   : > { %v953_v25 = vpop.f32.mrf.mxu0  ;;  %p1803_p2 = pneg %p1802_p1 }
 0x2f2   : > { %p1808_p8 = pnand %p1807_p7, %p1803_p2 }
 0x322   : > { %v1024_v28 = vpop.permute.xlu2 %1023 }
 0x336   : > { %v1012_v26 = vpop.permute.xlu0 %1011 }
 0x337   : > { %1015 = vst.msk [vmem:[#allocation2] sm:$0xff] %vm1014_vm5, %v1012_v26 }
 0x33a   : > { %v1048_v35 = vpop.permute.xlu2 %1047 }
 0x33e   : > { %v1018_v27 = vpop.permute.xlu1 %1017 }
 0x33f   : > { %1021 = vst.msk [vmem:[#allocation2] sm:$0xff] %vm1020_vm6, %v1018_v27 }
 0x340   : > { %1027 = vst.msk [vmem:[#allocation2] sm:$0xff] %vm1026_vm7, %v1024_v28  ;;  %v1030_v29 = vpop.permute.xlu0 %1029 }
 0x341   : > { %1033 = vst.msk [vmem:[#allocation2] sm:$0xff] %vm1032_vm8, %v1030_v29 }
 0x34e   : > { %v1042_v34 = vpop.permute.xlu0 %1041 }
 0x35d   : > { %v1036_v32 = vpop.permute.xlu1 %1035 }
 0x35e   : > { %1039 = vst.msk [vmem:[#allocation2] sm:$0xff] %vm1038_vm9, %v1036_v32 }
 0x35f   : > { %1045 = vst.msk [vmem:[#allocation2] sm:$0xff] %vm1044_vm10, %v1042_v34 }
 0x360   : > { %1051 = vst.msk [vmem:[#allocation2] sm:$0xff] %vm1050_vm11, %v1048_v35 }
 0x367   : > { %v1052_v36 = vld [vmem:[#allocation2] sm:$0xff] }
 0x368   : > { %v1053_v37 = vpack.c.bf16 %v1052_v36, %v1052_v36 }
 0x36a   : > { %1429 = vmatmul.msk.bf16.vlgmr.msra.gmra.mxu3 %vm432_vm0, %v1053_v37 }
 0x3ed   : > { %v1083_v39 = vpop.f32.mrf.mxu3 }
 0x3ee   : > { %v1084_v40 = vadd.f32 %v1083_v39, %v1058_v38 }
 0x3f0   : > { %v1087_v41 = vadd.f32 %v1084_v40, %v2052_v5  ;;  %v1469_v5 = vld [vmem:[#allocation8 + $0x8] sm:$0xff] }
 0x3f1   : > { %1150 = vmatpush.bf16.msrb.mxu0 %v1469_v5 }
 0x3f2   : > { %v1088_v42 = vsel %vm432_vm0, %v1087_v41, 0.0 }
 0x3f3   : > { %1089 = vadd.xlane.f32.xlu1 %v1088_v42 }
 0x3f5   : > { %v1085_v43 = vpop.f32.mrf.mxu3  ;;  %1151 = vmatpush.bf16.msrb.mxu0 %v1468_v56 }
 0x466   : > { %v1090_v51 = vpop.xlane.xlu1 %1089 }
 0x467   : > { %v1098_v52 = vmul.f32 %v1097_v50, %v1090_v51 }
 0x469   : > { %v1099_v53 = vsub.f32 %v1087_v41, %v1098_v52  ;;  %v1232_v41 = vperm.slane %v2059_v8, 7 }
 0x46b   : > { %v1100_v54 = vmul.f32 %v1099_v53, %v1099_v53 }
 0x46d   : > { %v1101_v55 = vsel %vm432_vm0, %v1100_v54, 0.0 }
 0x46e   : > { %1102 = vadd.xlane.f32.xlu0 %v1101_v55 }
 0x4e1   : > { %v1103_v57 = vpop.xlane.xlu0 %1102 }
 0x4e2   : > { %v1104_v58 = vmul.f32 %v1103_v57, %v1097_v50 }
 0x4e4   : > { %v1105_v60 = vadd.f32 1e-05, %v1104_v58 }
 0x4e6   : > { %1630 = vrsqrt.f32 %v1105_v60  ;;  %vm1112_vm14 = vweird.f32 %v1105_v60 }
 0x4ec   : > { %v1631_v61 = vpop.eup %1630 }
 0x4ed   : > { %v1107_v62 = vmul.f32 %v1631_v61, %v1105_v60  ;;  %vm1113_vm13 = vweird.f32 %v1631_v61 }
 0x4ee   : > { %vm1114_vm15 = vmor %vm1112_vm14, %vm1113_vm13 }
 0x4ef   : > { %v1108_v63 = vmul.f32 %v1631_v61, %v1107_v62 }
 0x4f1   : > { %v1109_v0 = vmul.f32 0.5, %v1108_v63 }
 0x4f3   : > { %v1110_v1 = vsub.f32 1.5, %v1109_v0 }
 0x4f5   : > { %v1111_v2 = vmul.f32 %v1631_v61, %v1110_v1 }
 0x4f7   : > { %v1115_v4 = vsel %vm1114_vm15, %v1631_v61, %v1111_v2 }
 0x4f8   : > { %v1116_v7 = vmul.f32 %v1115_v4, %v1099_v53 }
 0x4fa   : > { %v1118_v9 = vmul.f32 %v1117_v3, %v1116_v7 }
 0x4fc   : > { %v1120_v10 = vadd.f32 %v1119_v6, %v1118_v9 }
 0x4fe   : > { %v1121_v24 = vpack.c.bf16 %v1120_v10, %v1120_v10 }
 0x500   : > { %1438 = vmatmul.msk.bf16.vlgmr.msrb.gmra.mxu0 %vm432_vm0, %v1121_v24 }
 0x57d   : > { %v1153_v14 = vpop.f32.mrf.mxu0 }
 0x57e   : > { %v1154_v15 = vadd.f32 %v1594_v13, %v1153_v14 }
 0x580   : > { %v1157_v16 = vmax.f32 %v1154_v15, 0.0 }
 0x582   : > { %v1158_v17 = vpack.c.bf16 %v1157_v16, %v1157_v16 }
 0x584   : > { %1455 = vmatmul.msk.bf16.vlgmr.msrb.gmra.mxu1 %vm1192_vm1, %v1158_v17 }
 0x585   : > { %v1155_v18 = vpop.f32.mrf.mxu0 }
 0x601   : > { %v1205_v20 = vpop.f32.mrf.mxu1 }
 0x602   : > { %v1206_v21 = vadd.f32 %v1205_v20, %v1167_v19 }
 0x604   : > { %v1209_v22 = vadd.f32 %v1206_v21, %v1120_v10 }
 0x606   : > { %v1210_v23 = vsel %vm432_vm0, %v1209_v22, 0.0 }
 0x607   : > { %1211 = vadd.xlane.f32.xlu2 %v1210_v23 }
 0x609   : > { %v1207_v25 = vpop.f32.mrf.mxu1 }
 0x67a   : > { %v1212_v26 = vpop.xlane.xlu2 %1211 }
 0x67b   : > { %v1213_v27 = vmul.f32 %v1212_v26, %v1097_v50 }
 0x67d   : > { %v1214_v28 = vsub.f32 %v1209_v22, %v1213_v27 }
 0x67f   : > { %v1215_v29 = vmul.f32 %v1214_v28, %v1214_v28 }
 0x681   : > { %v1216_v30 = vsel %vm432_vm0, %v1215_v29, 0.0 }
 0x682   : > { %1217 = vadd.xlane.f32.xlu1 %v1216_v30 }
 0x6f5   : > { %v1218_v31 = vpop.xlane.xlu1 %1217 }
 0x6f6   : > { %v1219_v32 = vmul.f32 %v1218_v31, %v1097_v50 }
 0x6f8   : > { %v1220_v34 = vadd.f32 1e-05, %v1219_v32 }
 0x6fa   : > { %1632 = vrsqrt.f32 %v1220_v34  ;;  %vm1227_vm3 = vweird.f32 %v1220_v34 }
 0x700   : > { %v1633_v35 = vpop.eup %1632 }
 0x701   : > { %v1222_v36 = vmul.f32 %v1633_v35, %v1220_v34  ;;  %vm1228_vm2 = vweird.f32 %v1633_v35 }
 0x702   : > { %vm1229_vm4 = vmor %vm1227_vm3, %vm1228_vm2 }
 0x703   : > { %v1223_v37 = vmul.f32 %v1633_v35, %v1222_v36 }
 0x705   : > { %v1224_v38 = vmul.f32 0.5, %v1223_v37 }
 0x707   : > { %v1225_v39 = vsub.f32 1.5, %v1224_v38 }
 0x709   : > { %v1226_v40 = vmul.f32 %v1633_v35, %v1225_v39 }
 0x70b   : > { %v1230_v42 = vsel %vm1229_vm4, %v1633_v35, %v1226_v40 }
 0x70c   : > { %v1231_v43 = vmul.f32 %v1230_v42, %v1214_v28 }
 0x70e   : > { %v1233_v45 = vmul.f32 %v1232_v41, %v1231_v43 }
 0x710   : > { %v1235_v46 = vadd.f32 %v1595_v44, %v1233_v45 }
 0x712   : > { %1236 = vst.msk [vmem:[%s404_s18] sm:$0xff] %vm432_vm0, %v1235_v46 }
 0x713   : > { %1811 = shalt.err (!%p1808_p8)
}
 0x714   : > { %1494 = dma.vmem_to_hbm [thread:$0]  (%p1973_p5), %s1251_s20, 128, %s1253_s21, %s1238_s13  }
 0x715 PF: > { %s2243_s14 = sld [smem:[#allocation17_spill]]  ;;  %p1526_p9 = scmp.ge.s32.totalorder %s1858_s12, 2 }
 0x717   : > { %p1513_p10 = pnand %p1526_p9, %p1977_p6 }
 0x719   : > { %p1514_p11 = pneg %p1513_p10 }
 0x71b   : > { %s1264_s27 = sand.u32 1, %s2243_s14  }
 0x71c   : > { %s1265_s23 = scalar_lea.sflag [#allocation5], %s1264_s27 }
 0x71d   : > { %1841 = dma.done.wait (%p1514_p11), %s1265_s23, 128  }
 0x71e   : > { %1843 = vsyncadd (%p1514_p11), %s1265_s23, 4294967168  ;;  %s2245_s12 = sld [smem:[#allocation19_spill]]  ;;  %s2248_s30 = smov %s1850_s10 }
 0x71f   : > { %s2246_s4 = sld [smem:[#allocation18_spill]] }
 0x720   : > { %s2247_s11 = sld [smem:[#allocation20_spill]] }
 0x724   : > { %p22_p12 = scmp.ge.s32.totalorder %s2245_s12, 4  }
 0x725   : > { %s2249_s10 = smov %s2246_s4 }
 0x726   :  { %24 = sbr.rel (!%p22_p12) target bundleno = 9 (0x9), region = 112 }
 0x72b   :  { %1271 = vsyncpa [#allocation4], 1 }
 0x72c   :  { %1273 = vsyncpa [#allocation4 + $0x1], 1 }
 0x72d   :  { %1274 = vsyncpa [#allocation7], 1 }
 0x72e   :  { %1275 = vsyncpa [#allocation10], 1 }
 0x72f   :  { %1276 = vsyncpa [#allocation5], 1 }
 0x730   :  { %1278 = vsyncpa [#allocation5 + $0x1], 1 }

</bundles_post_ra>
